<compile_context>
chip_gen: v7x
topology: tpu7x:2x2x1
jax: 0.10.0
libtpu: 0.0.40
codegen_flags: <defaults>
</compile_context>

<pallas_src>
import math

import jax
import jax.numpy as jnp
from jax import lax
from jax.experimental import pallas as pl
from jax.experimental.pallas import tpu as pltpu


_LANES = 128
_SUBLANES = 8
_CHUNK = _LANES * _SUBLANES  # 1024 batch elements per in-kernel micro-chunk


def _round_up(n, m):
    return ((n + m - 1) // m) * m


def _layer(xs, w_ref, b_ref, out_dim, in_dim):
    """One Linear layer on an (8, 128) batch micro-chunk.

    xs:     list of `in_dim` (8,128) activations (one full vreg per feature)
    w_ref:  (out_dim*in_dim, 8, 128) pre-splatted weights; row j*in_dim + k
            holds w[j, k] replicated across the whole vreg.
    b_ref:  (out_dim, 8, 128) pre-splatted biases.
    Returns list of `out_dim` (8,128) pre-activation outputs.
    """
    outs = []
    for j in range(out_dim):
        acc = b_ref[j]                              # vld (bias vreg)
        for k in range(in_dim):                     # K <= 10: fully unrolled
            acc = acc + w_ref[j * in_dim + k] * xs[k]   # vld + vmul + vadd
        outs.append(acc)
    return outs


def red_mlp_kernel(x_ref, w1_ref, b1_ref, w2_ref, b2_ref, w3_ref, b3_ref, o_ref):
    # x_ref: (2, C, 128), o_ref: (C, 128) with C = tile_b // 128 (multiple of 8)
    n_chunks = x_ref.shape[1] // _SUBLANES

    def chunk_body(c, carry):
        s = pl.multiple_of(c * _SUBLANES, _SUBLANES)
        x0 = x_ref[0, pl.ds(s, _SUBLANES), :]        # (8, 128)
        x1 = x_ref[1, pl.ds(s, _SUBLANES), :]        # (8, 128)

        h1 = [jnp.maximum(a, 0.0)
              for a in _layer([x0, x1], w1_ref, b1_ref, 10, 2)]
        h2 = [jnp.maximum(a, 0.0)
              for a in _layer(h1, w2_ref, b2_ref, 10, 10)]
        (z,) = _layer(h2, w3_ref, b3_ref, 1, 10)

        # sigmoid(z) = 0.5 * (tanh(z/2) + 1): single EUP op, VALU-free epilogue.
        o_ref[pl.ds(s, _SUBLANES), :] = 0.5 * (jnp.tanh(0.5 * z) + 1.0)
        return carry

    lax.fori_loop(0, n_chunks, chunk_body, 0)


def red_forward(x, params, tile_b=None):
    """x: (B, 2) float32 (torch layout). Returns (B, 1) float32.

    params: w1 (10,2), b1 (10,), w2 (10,10), b2 (10,), w3 (1,10), b3 (1,)
            in torch's (out, in) weight layout.
    """
    B = x.shape[0]
    assert x.shape[1] == 2

    w1, b1 = params["w1"], params["b1"]
    w2, b2 = params["w2"], params["b2"]
    w3, b3 = params["w3"], params["b3"]

    if tile_b is None:
        # Aim for >=4 grid steps when there is enough work (v7x megacore +
        # pipelining) while capping the streamed DMA tile at 8192 elements.
        tile_b = min(8192, _round_up(pl.cdiv(B, 4), _CHUNK))
    # Never trust the caller: tile must be a multiple of 8*128.
    tile_b = max(_CHUNK, _round_up(tile_b, _CHUNK))
    Bp = _round_up(B, tile_b)
    n_tiles = Bp // tile_b
    c_tile = tile_b // _LANES                       # sublane rows per grid tile

    # Batch on lanes AND sublanes: (features, Bp//128, 128). Padded lanes
    # compute sigmoid(relu(bias)) garbage that is sliced off below.
    xt = jnp.pad(x.T, ((0, 0), (0, Bp - B))).reshape(2, Bp // _LANES, _LANES)

    # Pre-splat the tiny parameters into full (8,128) vregs (resident in VMEM):
    # the inner FMAs then consume plain vector loads instead of per-k
    # lane/sublane broadcasts on the binding VALU/XLU slots.
    def splat(a):
        flat = a.reshape(-1).astype(jnp.float32)
        return jnp.broadcast_to(flat[:, None, None],
                                (flat.shape[0], _SUBLANES, _LANES))

    w1b, b1b = splat(w1), splat(b1)                 # (20,8,128), (10,8,128)
    w2b, b2b = splat(w2), splat(b2)                 # (100,8,128), (10,8,128)
    w3b, b3b = splat(w3), splat(b3)                 # (10,8,128), (1,8,128)

    def const_spec(n):                              # resident across the grid
        return pl.BlockSpec((n, _SUBLANES, _LANES), lambda i: (0, 0, 0))

    out = pl.pallas_call(
        red_mlp_kernel,
        out_shape=jax.ShapeDtypeStruct((Bp // _LANES, _LANES), jnp.float32),
        grid=(n_tiles,),
        in_specs=[
            pl.BlockSpec((2, c_tile, _LANES), lambda i: (0, i, 0)),  # x streamed
            const_spec(20), const_spec(10),
            const_spec(100), const_spec(10),
            const_spec(10), const_spec(1),
        ],
        out_specs=pl.BlockSpec((c_tile, _LANES), lambda i: (i, 0)),
        compiler_params=pltpu.CompilerParams(
            dimension_semantics=("parallel",),       # shard batch across TCs (v7x)
        ),
    )(xt, w1b, b1b, w2b, b2b, w3b, b3b)

    return out.reshape(Bp)[:B].reshape(B, 1)


def init_params(key):
    """Deterministic init mirroring nn.Linear's default U(-1/sqrt(fan_in), +)."""
    def linear(key, fan_in, fan_out):
        kw, kb = jax.random.split(key)
        bound = 1.0 / math.sqrt(fan_in)
        w = jax.random.uniform(kw, (fan_out, fan_in), jnp.float32, -bound, bound)
        b = jax.random.uniform(kb, (fan_out,), jnp.float32, -bound, bound)
        return w, b

    k1, k2, k3 = jax.random.split(key, 3)
    w1, b1 = linear(k1, 2, 10)
    w2, b2 = linear(k2, 10, 10)
    w3, b3 = linear(k3, 10, 1)
    return {"w1": w1, "b1": b1, "w2": w2, "b2": b2, "w3": w3, "b3": b3}


def red_forward_ref(x, p):
    """Pure-JAX reference (torch layout) for correctness checking."""
    h1 = jnp.maximum(x @ p["w1"].T + p["b1"], 0.0)
    h2 = jnp.maximum(h1 @ p["w2"].T + p["b2"], 0.0)
    return jax.nn.sigmoid(h2 @ p["w3"].T + p["b3"])


if __name__ == "__main__":
    key = jax.random.PRNGKey(0)
    k_params, k_x, k_x2 = jax.random.split(key, 3)
    params = init_params(k_params)

    x = jax.random.normal(k_x, (2500, 2), jnp.float32)
    ref = red_forward_ref(x, params)

    # Default tiling: tile_b=1024 -> grid=(3,), exercises batch padding.
    out = jax.block_until_ready(red_forward(x, params))
    assert out.shape == (2500, 1)
    assert jnp.allclose(out, ref, atol=2e-5, rtol=1e-5)

    # Explicit larger tile: grid=(2,), 2 micro-chunks per tile (inner loop).
    out2 = jax.block_until_ready(red_forward(x, params, tile_b=2048))
    assert jnp.allclose(out2, ref, atol=2e-5, rtol=1e-5)

    # Bad caller tile (not a multiple of 8*128) gets rounded up internally.
    out3 = jax.block_until_ready(red_forward(x, params, tile_b=1000))
    assert jnp.allclose(out3, ref, atol=2e-5, rtol=1e-5)

    # Tiny batch (like the original toy training loop) also works.
    x_small = jax.random.normal(k_x2, (8, 2), jnp.float32)
    out_small = jax.block_until_ready(red_forward(x_small, params))
    assert out_small.shape == (8, 1)
    assert jnp.allclose(out_small, red_forward_ref(x_small, params),
                        atol=2e-5, rtol=1e-5)

    print("KERNEL_OK")
</pallas_src>

<mosaic_0001>
module attributes {stable_mosaic.version = 11 : i64} {
  func.func @red_mlp_kernel(%arg0: i32, %arg1: memref<2x8x128xf32, #tpu.memory_space<vmem>>, %arg2: memref<20x8x128xf32, #tpu.memory_space<vmem>>, %arg3: memref<10x8x128xf32, #tpu.memory_space<vmem>>, %arg4: memref<100x8x128xf32, #tpu.memory_space<vmem>>, %arg5: memref<10x8x128xf32, #tpu.memory_space<vmem>>, %arg6: memref<10x8x128xf32, #tpu.memory_space<vmem>>, %arg7: memref<1x8x128xf32, #tpu.memory_space<vmem>>, %arg8: memref<8x128xf32, #tpu.memory_space<vmem>>) attributes {dimension_semantics = [#tpu.dimension_semantics<parallel>], iteration_bounds = array<i64: 3>, scalar_prefetch = 0 : i64, scratch_operands = 0 : i64, tpu.core_type = #tpu.core_type<tc>, window_params = [{transform_indices = @transform_0, window_bounds = array<i64: 2, 8, 128>}, {pipeline_mode = #tpu.pipeline_mode<synchronous>, transform_indices = @transform_1, window_bounds = array<i64: 20, 8, 128>}, {pipeline_mode = #tpu.pipeline_mode<synchronous>, transform_indices = @transform_2, window_bounds = array<i64: 10, 8, 128>}, {pipeline_mode = #tpu.pipeline_mode<synchronous>, transform_indices = @transform_3, window_bounds = array<i64: 100, 8, 128>}, {pipeline_mode = #tpu.pipeline_mode<synchronous>, transform_indices = @transform_4, window_bounds = array<i64: 10, 8, 128>}, {pipeline_mode = #tpu.pipeline_mode<synchronous>, transform_indices = @transform_5, window_bounds = array<i64: 10, 8, 128>}, {pipeline_mode = #tpu.pipeline_mode<synchronous>, transform_indices = @transform_6, window_bounds = array<i64: 1, 8, 128>}, {transform_indices = @transform_7, window_bounds = array<i64: 8, 128>}]} {
    %c0_i32 = arith.constant 0 : i32
    %c8_i32 = arith.constant 8 : i32
    %0 = arith.muli %c0_i32, %c8_i32 : i32
    %1 = tpu.assume_multiple %0, 8 : i32
    %c0 = arith.constant 0 : index
    %2 = arith.index_cast %1 : i32 to index
    %c0_0 = arith.constant 0 : index
    %3 = vector.load %arg1[%c0, %2, %c0_0] : memref<2x8x128xf32, #tpu.memory_space<vmem>>, vector<1x8x128xf32>
    %4 = vector.shape_cast %3 : vector<1x8x128xf32> to vector<8x128xf32>
    %c1 = arith.constant 1 : index
    %5 = arith.index_cast %1 : i32 to index
    %c0_1 = arith.constant 0 : index
    %6 = vector.load %arg1[%c1, %5, %c0_1] : memref<2x8x128xf32, #tpu.memory_space<vmem>>, vector<1x8x128xf32>
    %7 = vector.shape_cast %6 : vector<1x8x128xf32> to vector<8x128xf32>
    %c0_2 = arith.constant 0 : index
    %c0_3 = arith.constant 0 : index
    %c0_4 = arith.constant 0 : index
    %8 = vector.load %arg3[%c0_2, %c0_3, %c0_4] : memref<10x8x128xf32, #tpu.memory_space<vmem>>, vector<1x8x128xf32>
    %9 = vector.shape_cast %8 : vector<1x8x128xf32> to vector<8x128xf32>
    %c0_5 = arith.constant 0 : index
    %c0_6 = arith.constant 0 : index
    %c0_7 = arith.constant 0 : index
    %10 = vector.load %arg2[%c0_5, %c0_6, %c0_7] : memref<20x8x128xf32, #tpu.memory_space<vmem>>, vector<1x8x128xf32>
    %11 = vector.shape_cast %10 : vector<1x8x128xf32> to vector<8x128xf32>
    %12 = arith.mulf %11, %4 : vector<8x128xf32>
    %13 = arith.addf %9, %12 : vector<8x128xf32>
    %c1_8 = arith.constant 1 : index
    %c0_9 = arith.constant 0 : index
    %c0_10 = arith.constant 0 : index
    %14 = vector.load %arg2[%c1_8, %c0_9, %c0_10] : memref<20x8x128xf32, #tpu.memory_space<vmem>>, vector<1x8x128xf32>
    %15 = vector.shape_cast %14 : vector<1x8x128xf32> to vector<8x128xf32>
    %16 = arith.mulf %15, %7 : vector<8x128xf32>
    %17 = arith.addf %13, %16 : vector<8x128xf32>
    %c1_11 = arith.constant 1 : index
    %c0_12 = arith.constant 0 : index
    %c0_13 = arith.constant 0 : index
    %18 = vector.load %arg3[%c1_11, %c0_12, %c0_13] : memref<10x8x128xf32, #tpu.memory_space<vmem>>, vector<1x8x128xf32>
    %19 = vector.shape_cast %18 : vector<1x8x128xf32> to vector<8x128xf32>
    %c2 = arith.constant 2 : index
    %c0_14 = arith.constant 0 : index
    %c0_15 = arith.constant 0 : index
    %20 = vector.load %arg2[%c2, %c0_14, %c0_15] : memref<20x8x128xf32, #tpu.memory_space<vmem>>, vector<1x8x128xf32>
    %21 = vector.shape_cast %20 : vector<1x8x128xf32> to vector<8x128xf32>
    %22 = arith.mulf %21, %4 : vector<8x128xf32>
    %23 = arith.addf %19, %22 : vector<8x128xf32>
    %c3 = arith.constant 3 : index
    %c0_16 = arith.constant 0 : index
    %c0_17 = arith.constant 0 : index
    %24 = vector.load %arg2[%c3, %c0_16, %c0_17] : memref<20x8x128xf32, #tpu.memory_space<vmem>>, vector<1x8x128xf32>
    %25 = vector.shape_cast %24 : vector<1x8x128xf32> to vector<8x128xf32>
    %26 = arith.mulf %25, %7 : vector<8x128xf32>
    %27 = arith.addf %23, %26 : vector<8x128xf32>
    %c2_18 = arith.constant 2 : index
    %c0_19 = arith.constant 0 : index
    %c0_20 = arith.constant 0 : index
    %28 = vector.load %arg3[%c2_18, %c0_19, %c0_20] : memref<10x8x128xf32, #tpu.memory_space<vmem>>, vector<1x8x128xf32>
    %29 = vector.shape_cast %28 : vector<1x8x128xf32> to vector<8x128xf32>
    %c4 = arith.constant 4 : index
    %c0_21 = arith.constant 0 : index
    %c0_22 = arith.constant 0 : index
    %30 = vector.load %arg2[%c4, %c0_21, %c0_22] : memref<20x8x128xf32, #tpu.memory_space<vmem>>, vector<1x8x128xf32>
    %31 = vector.shape_cast %30 : vector<1x8x128xf32> to vector<8x128xf32>
    %32 = arith.mulf %31, %4 : vector<8x128xf32>
    %33 = arith.addf %29, %32 : vector<8x128xf32>
    %c5 = arith.constant 5 : index
    %c0_23 = arith.constant 0 : index
    %c0_24 = arith.constant 0 : index
    %34 = vector.load %arg2[%c5, %c0_23, %c0_24] : memref<20x8x128xf32, #tpu.memory_space<vmem>>, vector<1x8x128xf32>
    %35 = vector.shape_cast %34 : vector<1x8x128xf32> to vector<8x128xf32>
    %36 = arith.mulf %35, %7 : vector<8x128xf32>
    %37 = arith.addf %33, %36 : vector<8x128xf32>
    %c3_25 = arith.constant 3 : index
    %c0_26 = arith.constant 0 : index
    %c0_27 = arith.constant 0 : index
    %38 = vector.load %arg3[%c3_25, %c0_26, %c0_27] : memref<10x8x128xf32, #tpu.memory_space<vmem>>, vector<1x8x128xf32>
    %39 = vector.shape_cast %38 : vector<1x8x128xf32> to vector<8x128xf32>
    %c6 = arith.constant 6 : index
    %c0_28 = arith.constant 0 : index
    %c0_29 = arith.constant 0 : index
    %40 = vector.load %arg2[%c6, %c0_28, %c0_29] : memref<20x8x128xf32, #tpu.memory_space<vmem>>, vector<1x8x128xf32>
    %41 = vector.shape_cast %40 : vector<1x8x128xf32> to vector<8x128xf32>
    %42 = arith.mulf %41, %4 : vector<8x128xf32>
    %43 = arith.addf %39, %42 : vector<8x128xf32>
    %c7 = arith.constant 7 : index
    %c0_30 = arith.constant 0 : index
    %c0_31 = arith.constant 0 : index
    %44 = vector.load %arg2[%c7, %c0_30, %c0_31] : memref<20x8x128xf32, #tpu.memory_space<vmem>>, vector<1x8x128xf32>
    %45 = vector.shape_cast %44 : vector<1x8x128xf32> to vector<8x128xf32>
    %46 = arith.mulf %45, %7 : vector<8x128xf32>
    %47 = arith.addf %43, %46 : vector<8x128xf32>
    %c4_32 = arith.constant 4 : index
    %c0_33 = arith.constant 0 : index
    %c0_34 = arith.constant 0 : index
    %48 = vector.load %arg3[%c4_32, %c0_33, %c0_34] : memref<10x8x128xf32, #tpu.memory_space<vmem>>, vector<1x8x128xf32>
    %49 = vector.shape_cast %48 : vector<1x8x128xf32> to vector<8x128xf32>
    %c8 = arith.constant 8 : index
    %c0_35 = arith.constant 0 : index
    %c0_36 = arith.constant 0 : index
    %50 = vector.load %arg2[%c8, %c0_35, %c0_36] : memref<20x8x128xf32, #tpu.memory_space<vmem>>, vector<1x8x128xf32>
    %51 = vector.shape_cast %50 : vector<1x8x128xf32> to vector<8x128xf32>
    %52 = arith.mulf %51, %4 : vector<8x128xf32>
    %53 = arith.addf %49, %52 : vector<8x128xf32>
    %c9 = arith.constant 9 : index
    %c0_37 = arith.constant 0 : index
    %c0_38 = arith.constant 0 : index
    %54 = vector.load %arg2[%c9, %c0_37, %c0_38] : memref<20x8x128xf32, #tpu.memory_space<vmem>>, vector<1x8x128xf32>
    %55 = vector.shape_cast %54 : vector<1x8x128xf32> to vector<8x128xf32>
    %56 = arith.mulf %55, %7 : vector<8x128xf32>
    %57 = arith.addf %53, %56 : vector<8x128xf32>
    %c5_39 = arith.constant 5 : index
    %c0_40 = arith.constant 0 : index
    %c0_41 = arith.constant 0 : index
    %58 = vector.load %arg3[%c5_39, %c0_40, %c0_41] : memref<10x8x128xf32, #tpu.memory_space<vmem>>, vector<1x8x128xf32>
    %59 = vector.shape_cast %58 : vector<1x8x128xf32> to vector<8x128xf32>
    %c10 = arith.constant 10 : index
    %c0_42 = arith.constant 0 : index
    %c0_43 = arith.constant 0 : index
    %60 = vector.load %arg2[%c10, %c0_42, %c0_43] : memref<20x8x128xf32, #tpu.memory_space<vmem>>, vector<1x8x128xf32>
    %61 = vector.shape_cast %60 : vector<1x8x128xf32> to vector<8x128xf32>
    %62 = arith.mulf %61, %4 : vector<8x128xf32>
    %63 = arith.addf %59, %62 : vector<8x128xf32>
    %c11 = arith.constant 11 : index
    %c0_44 = arith.constant 0 : index
    %c0_45 = arith.constant 0 : index
    %64 = vector.load %arg2[%c11, %c0_44, %c0_45] : memref<20x8x128xf32, #tpu.memory_space<vmem>>, vector<1x8x128xf32>
    %65 = vector.shape_cast %64 : vector<1x8x128xf32> to vector<8x128xf32>
    %66 = arith.mulf %65, %7 : vector<8x128xf32>
    %67 = arith.addf %63, %66 : vector<8x128xf32>
    %c6_46 = arith.constant 6 : index
    %c0_47 = arith.constant 0 : index
    %c0_48 = arith.constant 0 : index
    %68 = vector.load %arg3[%c6_46, %c0_47, %c0_48] : memref<10x8x128xf32, #tpu.memory_space<vmem>>, vector<1x8x128xf32>
    %69 = vector.shape_cast %68 : vector<1x8x128xf32> to vector<8x128xf32>
    %c12 = arith.constant 12 : index
    %c0_49 = arith.constant 0 : index
    %c0_50 = arith.constant 0 : index
    %70 = vector.load %arg2[%c12, %c0_49, %c0_50] : memref<20x8x128xf32, #tpu.memory_space<vmem>>, vector<1x8x128xf32>
    %71 = vector.shape_cast %70 : vector<1x8x128xf32> to vector<8x128xf32>
    %72 = arith.mulf %71, %4 : vector<8x128xf32>
    %73 = arith.addf %69, %72 : vector<8x128xf32>
    %c13 = arith.constant 13 : index
    %c0_51 = arith.constant 0 : index
    %c0_52 = arith.constant 0 : index
    %74 = vector.load %arg2[%c13, %c0_51, %c0_52] : memref<20x8x128xf32, #tpu.memory_space<vmem>>, vector<1x8x128xf32>
    %75 = vector.shape_cast %74 : vector<1x8x128xf32> to vector<8x128xf32>
    %76 = arith.mulf %75, %7 : vector<8x128xf32>
    %77 = arith.addf %73, %76 : vector<8x128xf32>
    %c7_53 = arith.constant 7 : index
    %c0_54 = arith.constant 0 : index
    %c0_55 = arith.constant 0 : index
    %78 = vector.load %arg3[%c7_53, %c0_54, %c0_55] : memref<10x8x128xf32, #tpu.memory_space<vmem>>, vector<1x8x128xf32>
    %79 = vector.shape_cast %78 : vector<1x8x128xf32> to vector<8x128xf32>
    %c14 = arith.constant 14 : index
    %c0_56 = arith.constant 0 : index
    %c0_57 = arith.constant 0 : index
    %80 = vector.load %arg2[%c14, %c0_56, %c0_57] : memref<20x8x128xf32, #tpu.memory_space<vmem>>, vector<1x8x128xf32>
    %81 = vector.shape_cast %80 : vector<1x8x128xf32> to vector<8x128xf32>
    %82 = arith.mulf %81, %4 : vector<8x128xf32>
    %83 = arith.addf %79, %82 : vector<8x128xf32>
    %c15 = arith.constant 15 : index
    %c0_58 = arith.constant 0 : index
    %c0_59 = arith.constant 0 : index
    %84 = vector.load %arg2[%c15, %c0_58, %c0_59] : memref<20x8x128xf32, #tpu.memory_space<vmem>>, vector<1x8x128xf32>
    %85 = vector.shape_cast %84 : vector<1x8x128xf32> to vector<8x128xf32>
    %86 = arith.mulf %85, %7 : vector<8x128xf32>
    %87 = arith.addf %83, %86 : vector<8x128xf32>
    %c8_60 = arith.constant 8 : index
    %c0_61 = arith.constant 0 : index
    %c0_62 = arith.constant 0 : index
    %88 = vector.load %arg3[%c8_60, %c0_61, %c0_62] : memref<10x8x128xf32, #tpu.memory_space<vmem>>, vector<1x8x128xf32>
    %89 = vector.shape_cast %88 : vector<1x8x128xf32> to vector<8x128xf32>
    %c16 = arith.constant 16 : index
    %c0_63 = arith.constant 0 : index
    %c0_64 = arith.constant 0 : index
    %90 = vector.load %arg2[%c16, %c0_63, %c0_64] : memref<20x8x128xf32, #tpu.memory_space<vmem>>, vector<1x8x128xf32>
    %91 = vector.shape_cast %90 : vector<1x8x128xf32> to vector<8x128xf32>
    %92 = arith.mulf %91, %4 : vector<8x128xf32>
    %93 = arith.addf %89, %92 : vector<8x128xf32>
    %c17 = arith.constant 17 : index
    %c0_65 = arith.constant 0 : index
    %c0_66 = arith.constant 0 : index
    %94 = vector.load %arg2[%c17, %c0_65, %c0_66] : memref<20x8x128xf32, #tpu.memory_space<vmem>>, vector<1x8x128xf32>
    %95 = vector.shape_cast %94 : vector<1x8x128xf32> to vector<8x128xf32>
    %96 = arith.mulf %95, %7 : vector<8x128xf32>
    %97 = arith.addf %93, %96 : vector<8x128xf32>
    %c9_67 = arith.constant 9 : index
    %c0_68 = arith.constant 0 : index
    %c0_69 = arith.constant 0 : index
    %98 = vector.load %arg3[%c9_67, %c0_68, %c0_69] : memref<10x8x128xf32, #tpu.memory_space<vmem>>, vector<1x8x128xf32>
    %99 = vector.shape_cast %98 : vector<1x8x128xf32> to vector<8x128xf32>
    %c18 = arith.constant 18 : index
    %c0_70 = arith.constant 0 : index
    %c0_71 = arith.constant 0 : index
    %100 = vector.load %arg2[%c18, %c0_70, %c0_71] : memref<20x8x128xf32, #tpu.memory_space<vmem>>, vector<1x8x128xf32>
    %101 = vector.shape_cast %100 : vector<1x8x128xf32> to vector<8x128xf32>
    %102 = arith.mulf %101, %4 : vector<8x128xf32>
    %103 = arith.addf %99, %102 : vector<8x128xf32>
    %c19 = arith.constant 19 : index
    %c0_72 = arith.constant 0 : index
    %c0_73 = arith.constant 0 : index
    %104 = vector.load %arg2[%c19, %c0_72, %c0_73] : memref<20x8x128xf32, #tpu.memory_space<vmem>>, vector<1x8x128xf32>
    %105 = vector.shape_cast %104 : vector<1x8x128xf32> to vector<8x128xf32>
    %106 = arith.mulf %105, %7 : vector<8x128xf32>
    %107 = arith.addf %103, %106 : vector<8x128xf32>
    %cst = arith.constant 0.000000e+00 : f32
    %108 = vector.broadcast %cst : f32 to vector<8x128xf32>
    %109 = arith.maximumf %17, %108 : vector<8x128xf32>
    %cst_74 = arith.constant 0.000000e+00 : f32
    %110 = vector.broadcast %cst_74 : f32 to vector<8x128xf32>
    %111 = arith.maximumf %27, %110 : vector<8x128xf32>
    %cst_75 = arith.constant 0.000000e+00 : f32
    %112 = vector.broadcast %cst_75 : f32 to vector<8x128xf32>
    %113 = arith.maximumf %37, %112 : vector<8x128xf32>
    %cst_76 = arith.constant 0.000000e+00 : f32
    %114 = vector.broadcast %cst_76 : f32 to vector<8x128xf32>
    %115 = arith.maximumf %47, %114 : vector<8x128xf32>
    %cst_77 = arith.constant 0.000000e+00 : f32
    %116 = vector.broadcast %cst_77 : f32 to vector<8x128xf32>
    %117 = arith.maximumf %57, %116 : vector<8x128xf32>
    %cst_78 = arith.constant 0.000000e+00 : f32
    %118 = vector.broadcast %cst_78 : f32 to vector<8x128xf32>
    %119 = arith.maximumf %67, %118 : vector<8x128xf32>
    %cst_79 = arith.constant 0.000000e+00 : f32
    %120 = vector.broadcast %cst_79 : f32 to vector<8x128xf32>
    %121 = arith.maximumf %77, %120 : vector<8x128xf32>
    %cst_80 = arith.constant 0.000000e+00 : f32
    %122 = vector.broadcast %cst_80 : f32 to vector<8x128xf32>
    %123 = arith.maximumf %87, %122 : vector<8x128xf32>
    %cst_81 = arith.constant 0.000000e+00 : f32
    %124 = vector.broadcast %cst_81 : f32 to vector<8x128xf32>
    %125 = arith.maximumf %97, %124 : vector<8x128xf32>
    %cst_82 = arith.constant 0.000000e+00 : f32
    %126 = vector.broadcast %cst_82 : f32 to vector<8x128xf32>
    %127 = arith.maximumf %107, %126 : vector<8x128xf32>
    %c0_83 = arith.constant 0 : index
    %c0_84 = arith.constant 0 : index
    %c0_85 = arith.constant 0 : index
    %128 = vector.load %arg5[%c0_83, %c0_84, %c0_85] : memref<10x8x128xf32, #tpu.memory_space<vmem>>, vector<1x8x128xf32>
    %129 = vector.shape_cast %128 : vector<1x8x128xf32> to vector<8x128xf32>
    %c0_86 = arith.constant 0 : index
    %c0_87 = arith.constant 0 : index
    %c0_88 = arith.constant 0 : index
    %130 = vector.load %arg4[%c0_86, %c0_87, %c0_88] : memref<100x8x128xf32, #tpu.memory_space<vmem>>, vector<1x8x128xf32>
    %131 = vector.shape_cast %130 : vector<1x8x128xf32> to vector<8x128xf32>
    %132 = arith.mulf %131, %109 : vector<8x128xf32>
    %133 = arith.addf %129, %132 : vector<8x128xf32>
    %c1_89 = arith.constant 1 : index
    %c0_90 = arith.constant 0 : index
    %c0_91 = arith.constant 0 : index
    %134 = vector.load %arg4[%c1_89, %c0_90, %c0_91] : memref<100x8x128xf32, #tpu.memory_space<vmem>>, vector<1x8x128xf32>
    %135 = vector.shape_cast %134 : vector<1x8x128xf32> to vector<8x128xf32>
    %136 = arith.mulf %135, %111 : vector<8x128xf32>
    %137 = arith.addf %133, %136 : vector<8x128xf32>
    %c2_92 = arith.constant 2 : index
    %c0_93 = arith.constant 0 : index
    %c0_94 = arith.constant 0 : index
    %138 = vector.load %arg4[%c2_92, %c0_93, %c0_94] : memref<100x8x128xf32, #tpu.memory_space<vmem>>, vector<1x8x128xf32>
    %139 = vector.shape_cast %138 : vector<1x8x128xf32> to vector<8x128xf32>
    %140 = arith.mulf %139, %113 : vector<8x128xf32>
    %141 = arith.addf %137, %140 : vector<8x128xf32>
    %c3_95 = arith.constant 3 : index
    %c0_96 = arith.constant 0 : index
    %c0_97 = arith.constant 0 : index
    %142 = vector.load %arg4[%c3_95, %c0_96, %c0_97] : memref<100x8x128xf32, #tpu.memory_space<vmem>>, vector<1x8x128xf32>
    %143 = vector.shape_cast %142 : vector<1x8x128xf32> to vector<8x128xf32>
    %144 = arith.mulf %143, %115 : vector<8x128xf32>
    %145 = arith.addf %141, %144 : vector<8x128xf32>
    %c4_98 = arith.constant 4 : index
    %c0_99 = arith.constant 0 : index
    %c0_100 = arith.constant 0 : index
    %146 = vector.load %arg4[%c4_98, %c0_99, %c0_100] : memref<100x8x128xf32, #tpu.memory_space<vmem>>, vector<1x8x128xf32>
    %147 = vector.shape_cast %146 : vector<1x8x128xf32> to vector<8x128xf32>
    %148 = arith.mulf %147, %117 : vector<8x128xf32>
    %149 = arith.addf %145, %148 : vector<8x128xf32>
    %c5_101 = arith.constant 5 : index
    %c0_102 = arith.constant 0 : index
    %c0_103 = arith.constant 0 : index
    %150 = vector.load %arg4[%c5_101, %c0_102, %c0_103] : memref<100x8x128xf32, #tpu.memory_space<vmem>>, vector<1x8x128xf32>
    %151 = vector.shape_cast %150 : vector<1x8x128xf32> to vector<8x128xf32>
    %152 = arith.mulf %151, %119 : vector<8x128xf32>
    %153 = arith.addf %149, %152 : vector<8x128xf32>
    %c6_104 = arith.constant 6 : index
    %c0_105 = arith.constant 0 : index
    %c0_106 = arith.constant 0 : index
    %154 = vector.load %arg4[%c6_104, %c0_105, %c0_106] : memref<100x8x128xf32, #tpu.memory_space<vmem>>, vector<1x8x128xf32>
    %155 = vector.shape_cast %154 : vector<1x8x128xf32> to vector<8x128xf32>
    %156 = arith.mulf %155, %121 : vector<8x128xf32>
    %157 = arith.addf %153, %156 : vector<8x128xf32>
    %c7_107 = arith.constant 7 : index
    %c0_108 = arith.constant 0 : index
    %c0_109 = arith.constant 0 : index
    %158 = vector.load %arg4[%c7_107, %c0_108, %c0_109] : memref<100x8x128xf32, #tpu.memory_space<vmem>>, vector<1x8x128xf32>
    %159 = vector.shape_cast %158 : vector<1x8x128xf32> to vector<8x128xf32>
    %160 = arith.mulf %159, %123 : vector<8x128xf32>
    %161 = arith.addf %157, %160 : vector<8x128xf32>
    %c8_110 = arith.constant 8 : index
    %c0_111 = arith.constant 0 : index
    %c0_112 = arith.constant 0 : index
    %162 = vector.load %arg4[%c8_110, %c0_111, %c0_112] : memref<100x8x128xf32, #tpu.memory_space<vmem>>, vector<1x8x128xf32>
    %163 = vector.shape_cast %162 : vector<1x8x128xf32> to vector<8x128xf32>
    %164 = arith.mulf %163, %125 : vector<8x128xf32>
    %165 = arith.addf %161, %164 : vector<8x128xf32>
    %c9_113 = arith.constant 9 : index
    %c0_114 = arith.constant 0 : index
    %c0_115 = arith.constant 0 : index
    %166 = vector.load %arg4[%c9_113, %c0_114, %c0_115] : memref<100x8x128xf32, #tpu.memory_space<vmem>>, vector<1x8x128xf32>
    %167 = vector.shape_cast %166 : vector<1x8x128xf32> to vector<8x128xf32>
    %168 = arith.mulf %167, %127 : vector<8x128xf32>
    %169 = arith.addf %165, %168 : vector<8x128xf32>
    %c1_116 = arith.constant 1 : index
    %c0_117 = arith.constant 0 : index
    %c0_118 = arith.constant 0 : index
    %170 = vector.load %arg5[%c1_116, %c0_117, %c0_118] : memref<10x8x128xf32, #tpu.memory_space<vmem>>, vector<1x8x128xf32>
    %171 = vector.shape_cast %170 : vector<1x8x128xf32> to vector<8x128xf32>
    %c10_119 = arith.constant 10 : index
    %c0_120 = arith.constant 0 : index
    %c0_121 = arith.constant 0 : index
    %172 = vector.load %arg4[%c10_119, %c0_120, %c0_121] : memref<100x8x128xf32, #tpu.memory_space<vmem>>, vector<1x8x128xf32>
    %173 = vector.shape_cast %172 : vector<1x8x128xf32> to vector<8x128xf32>
    %174 = arith.mulf %173, %109 : vector<8x128xf32>
    %175 = arith.addf %171, %174 : vector<8x128xf32>
    %c11_122 = arith.constant 11 : index
    %c0_123 = arith.constant 0 : index
    %c0_124 = arith.constant 0 : index
    %176 = vector.load %arg4[%c11_122, %c0_123, %c0_124] : memref<100x8x128xf32, #tpu.memory_space<vmem>>, vector<1x8x128xf32>
    %177 = vector.shape_cast %176 : vector<1x8x128xf32> to vector<8x128xf32>
    %178 = arith.mulf %177, %111 : vector<8x128xf32>
    %179 = arith.addf %175, %178 : vector<8x128xf32>
    %c12_125 = arith.constant 12 : index
    %c0_126 = arith.constant 0 : index
    %c0_127 = arith.constant 0 : index
    %180 = vector.load %arg4[%c12_125, %c0_126, %c0_127] : memref<100x8x128xf32, #tpu.memory_space<vmem>>, vector<1x8x128xf32>
    %181 = vector.shape_cast %180 : vector<1x8x128xf32> to vector<8x128xf32>
    %182 = arith.mulf %181, %113 : vector<8x128xf32>
    %183 = arith.addf %179, %182 : vector<8x128xf32>
    %c13_128 = arith.constant 13 : index
    %c0_129 = arith.constant 0 : index
    %c0_130 = arith.constant 0 : index
    %184 = vector.load %arg4[%c13_128, %c0_129, %c0_130] : memref<100x8x128xf32, #tpu.memory_space<vmem>>, vector<1x8x128xf32>
    %185 = vector.shape_cast %184 : vector<1x8x128xf32> to vector<8x128xf32>
    %186 = arith.mulf %185, %115 : vector<8x128xf32>
    %187 = arith.addf %183, %186 : vector<8x128xf32>
    %c14_131 = arith.constant 14 : index
    %c0_132 = arith.constant 0 : index
    %c0_133 = arith.constant 0 : index
    %188 = vector.load %arg4[%c14_131, %c0_132, %c0_133] : memref<100x8x128xf32, #tpu.memory_space<vmem>>, vector<1x8x128xf32>
    %189 = vector.shape_cast %188 : vector<1x8x128xf32> to vector<8x128xf32>
    %190 = arith.mulf %189, %117 : vector<8x128xf32>
    %191 = arith.addf %187, %190 : vector<8x128xf32>
    %c15_134 = arith.constant 15 : index
    %c0_135 = arith.constant 0 : index
    %c0_136 = arith.constant 0 : index
    %192 = vector.load %arg4[%c15_134, %c0_135, %c0_136] : memref<100x8x128xf32, #tpu.memory_space<vmem>>, vector<1x8x128xf32>
    %193 = vector.shape_cast %192 : vector<1x8x128xf32> to vector<8x128xf32>
    %194 = arith.mulf %193, %119 : vector<8x128xf32>
    %195 = arith.addf %191, %194 : vector<8x128xf32>
    %c16_137 = arith.constant 16 : index
    %c0_138 = arith.constant 0 : index
    %c0_139 = arith.constant 0 : index
    %196 = vector.load %arg4[%c16_137, %c0_138, %c0_139] : memref<100x8x128xf32, #tpu.memory_space<vmem>>, vector<1x8x128xf32>
    %197 = vector.shape_cast %196 : vector<1x8x128xf32> to vector<8x128xf32>
    %198 = arith.mulf %197, %121 : vector<8x128xf32>
    %199 = arith.addf %195, %198 : vector<8x128xf32>
    %c17_140 = arith.constant 17 : index
    %c0_141 = arith.constant 0 : index
    %c0_142 = arith.constant 0 : index
    %200 = vector.load %arg4[%c17_140, %c0_141, %c0_142] : memref<100x8x128xf32, #tpu.memory_space<vmem>>, vector<1x8x128xf32>
    %201 = vector.shape_cast %200 : vector<1x8x128xf32> to vector<8x128xf32>
    %202 = arith.mulf %201, %123 : vector<8x128xf32>
    %203 = arith.addf %199, %202 : vector<8x128xf32>
    %c18_143 = arith.constant 18 : index
    %c0_144 = arith.constant 0 : index
    %c0_145 = arith.constant 0 : index
    %204 = vector.load %arg4[%c18_143, %c0_144, %c0_145] : memref<100x8x128xf32, #tpu.memory_space<vmem>>, vector<1x8x128xf32>
    %205 = vector.shape_cast %204 : vector<1x8x128xf32> to vector<8x128xf32>
    %206 = arith.mulf %205, %125 : vector<8x128xf32>
    %207 = arith.addf %203, %206 : vector<8x128xf32>
    %c19_146 = arith.constant 19 : index
    %c0_147 = arith.constant 0 : index
    %c0_148 = arith.constant 0 : index
    %208 = vector.load %arg4[%c19_146, %c0_147, %c0_148] : memref<100x8x128xf32, #tpu.memory_space<vmem>>, vector<1x8x128xf32>
    %209 = vector.shape_cast %208 : vector<1x8x128xf32> to vector<8x128xf32>
    %210 = arith.mulf %209, %127 : vector<8x128xf32>
    %211 = arith.addf %207, %210 : vector<8x128xf32>
    %c2_149 = arith.constant 2 : index
    %c0_150 = arith.constant 0 : index
    %c0_151 = arith.constant 0 : index
    %212 = vector.load %arg5[%c2_149, %c0_150, %c0_151] : memref<10x8x128xf32, #tpu.memory_space<vmem>>, vector<1x8x128xf32>
    %213 = vector.shape_cast %212 : vector<1x8x128xf32> to vector<8x128xf32>
    %c20 = arith.constant 20 : index
    %c0_152 = arith.constant 0 : index
    %c0_153 = arith.constant 0 : index
    %214 = vector.load %arg4[%c20, %c0_152, %c0_153] : memref<100x8x128xf32, #tpu.memory_space<vmem>>, vector<1x8x128xf32>
    %215 = vector.shape_cast %214 : vector<1x8x128xf32> to vector<8x128xf32>
    %216 = arith.mulf %215, %109 : vector<8x128xf32>
    %217 = arith.addf %213, %216 : vector<8x128xf32>
    %c21 = arith.constant 21 : index
    %c0_154 = arith.constant 0 : index
    %c0_155 = arith.constant 0 : index
    %218 = vector.load %arg4[%c21, %c0_154, %c0_155] : memref<100x8x128xf32, #tpu.memory_space<vmem>>, vector<1x8x128xf32>
    %219 = vector.shape_cast %218 : vector<1x8x128xf32> to vector<8x128xf32>
    %220 = arith.mulf %219, %111 : vector<8x128xf32>
    %221 = arith.addf %217, %220 : vector<8x128xf32>
    %c22 = arith.constant 22 : index
    %c0_156 = arith.constant 0 : index
    %c0_157 = arith.constant 0 : index
    %222 = vector.load %arg4[%c22, %c0_156, %c0_157] : memref<100x8x128xf32, #tpu.memory_space<vmem>>, vector<1x8x128xf32>
    %223 = vector.shape_cast %222 : vector<1x8x128xf32> to vector<8x128xf32>
    %224 = arith.mulf %223, %113 : vector<8x128xf32>
    %225 = arith.addf %221, %224 : vector<8x128xf32>
    %c23 = arith.constant 23 : index
    %c0_158 = arith.constant 0 : index
    %c0_159 = arith.constant 0 : index
    %226 = vector.load %arg4[%c23, %c0_158, %c0_159] : memref<100x8x128xf32, #tpu.memory_space<vmem>>, vector<1x8x128xf32>
    %227 = vector.shape_cast %226 : vector<1x8x128xf32> to vector<8x128xf32>
    %228 = arith.mulf %227, %115 : vector<8x128xf32>
    %229 = arith.addf %225, %228 : vector<8x128xf32>
    %c24 = arith.constant 24 : index
    %c0_160 = arith.constant 0 : index
    %c0_161 = arith.constant 0 : index
    %230 = vector.load %arg4[%c24, %c0_160, %c0_161] : memref<100x8x128xf32, #tpu.memory_space<vmem>>, vector<1x8x128xf32>
    %231 = vector.shape_cast %230 : vector<1x8x128xf32> to vector<8x128xf32>
    %232 = arith.mulf %231, %117 : vector<8x128xf32>
    %233 = arith.addf %229, %232 : vector<8x128xf32>
    %c25 = arith.constant 25 : index
    %c0_162 = arith.constant 0 : index
    %c0_163 = arith.constant 0 : index
    %234 = vector.load %arg4[%c25, %c0_162, %c0_163] : memref<100x8x128xf32, #tpu.memory_space<vmem>>, vector<1x8x128xf32>
    %235 = vector.shape_cast %234 : vector<1x8x128xf32> to vector<8x128xf32>
    %236 = arith.mulf %235, %119 : vector<8x128xf32>
    %237 = arith.addf %233, %236 : vector<8x128xf32>
    %c26 = arith.constant 26 : index
    %c0_164 = arith.constant 0 : index
    %c0_165 = arith.constant 0 : index
    %238 = vector.load %arg4[%c26, %c0_164, %c0_165] : memref<100x8x128xf32, #tpu.memory_space<vmem>>, vector<1x8x128xf32>
    %239 = vector.shape_cast %238 : vector<1x8x128xf32> to vector<8x128xf32>
    %240 = arith.mulf %239, %121 : vector<8x128xf32>
    %241 = arith.addf %237, %240 : vector<8x128xf32>
    %c27 = arith.constant 27 : index
    %c0_166 = arith.constant 0 : index
    %c0_167 = arith.constant 0 : index
    %242 = vector.load %arg4[%c27, %c0_166, %c0_167] : memref<100x8x128xf32, #tpu.memory_space<vmem>>, vector<1x8x128xf32>
    %243 = vector.shape_cast %242 : vector<1x8x128xf32> to vector<8x128xf32>
    %244 = arith.mulf %243, %123 : vector<8x128xf32>
    %245 = arith.addf %241, %244 : vector<8x128xf32>
    %c28 = arith.constant 28 : index
    %c0_168 = arith.constant 0 : index
    %c0_169 = arith.constant 0 : index
    %246 = vector.load %arg4[%c28, %c0_168, %c0_169] : memref<100x8x128xf32, #tpu.memory_space<vmem>>, vector<1x8x128xf32>
    %247 = vector.shape_cast %246 : vector<1x8x128xf32> to vector<8x128xf32>
    %248 = arith.mulf %247, %125 : vector<8x128xf32>
    %249 = arith.addf %245, %248 : vector<8x128xf32>
    %c29 = arith.constant 29 : index
    %c0_170 = arith.constant 0 : index
    %c0_171 = arith.constant 0 : index
    %250 = vector.load %arg4[%c29, %c0_170, %c0_171] : memref<100x8x128xf32, #tpu.memory_space<vmem>>, vector<1x8x128xf32>
    %251 = vector.shape_cast %250 : vector<1x8x128xf32> to vector<8x128xf32>
    %252 = arith.mulf %251, %127 : vector<8x128xf32>
    %253 = arith.addf %249, %252 : vector<8x128xf32>
    %c3_172 = arith.constant 3 : index
    %c0_173 = arith.constant 0 : index
    %c0_174 = arith.constant 0 : index
    %254 = vector.load %arg5[%c3_172, %c0_173, %c0_174] : memref<10x8x128xf32, #tpu.memory_space<vmem>>, vector<1x8x128xf32>
    %255 = vector.shape_cast %254 : vector<1x8x128xf32> to vector<8x128xf32>
    %c30 = arith.constant 30 : index
    %c0_175 = arith.constant 0 : index
    %c0_176 = arith.constant 0 : index
    %256 = vector.load %arg4[%c30, %c0_175, %c0_176] : memref<100x8x128xf32, #tpu.memory_space<vmem>>, vector<1x8x128xf32>
    %257 = vector.shape_cast %256 : vector<1x8x128xf32> to vector<8x128xf32>
    %258 = arith.mulf %257, %109 : vector<8x128xf32>
    %259 = arith.addf %255, %258 : vector<8x128xf32>
    %c31 = arith.constant 31 : index
    %c0_177 = arith.constant 0 : index
    %c0_178 = arith.constant 0 : index
    %260 = vector.load %arg4[%c31, %c0_177, %c0_178] : memref<100x8x128xf32, #tpu.memory_space<vmem>>, vector<1x8x128xf32>
    %261 = vector.shape_cast %260 : vector<1x8x128xf32> to vector<8x128xf32>
    %262 = arith.mulf %261, %111 : vector<8x128xf32>
    %263 = arith.addf %259, %262 : vector<8x128xf32>
    %c32 = arith.constant 32 : index
    %c0_179 = arith.constant 0 : index
    %c0_180 = arith.constant 0 : index
    %264 = vector.load %arg4[%c32, %c0_179, %c0_180] : memref<100x8x128xf32, #tpu.memory_space<vmem>>, vector<1x8x128xf32>
    %265 = vector.shape_cast %264 : vector<1x8x128xf32> to vector<8x128xf32>
    %266 = arith.mulf %265, %113 : vector<8x128xf32>
    %267 = arith.addf %263, %266 : vector<8x128xf32>
    %c33 = arith.constant 33 : index
    %c0_181 = arith.constant 0 : index
    %c0_182 = arith.constant 0 : index
    %268 = vector.load %arg4[%c33, %c0_181, %c0_182] : memref<100x8x128xf32, #tpu.memory_space<vmem>>, vector<1x8x128xf32>
    %269 = vector.shape_cast %268 : vector<1x8x128xf32> to vector<8x128xf32>
    %270 = arith.mulf %269, %115 : vector<8x128xf32>
    %271 = arith.addf %267, %270 : vector<8x128xf32>
    %c34 = arith.constant 34 : index
    %c0_183 = arith.constant 0 : index
    %c0_184 = arith.constant 0 : index
    %272 = vector.load %arg4[%c34, %c0_183, %c0_184] : memref<100x8x128xf32, #tpu.memory_space<vmem>>, vector<1x8x128xf32>
    %273 = vector.shape_cast %272 : vector<1x8x128xf32> to vector<8x128xf32>
    %274 = arith.mulf %273, %117 : vector<8x128xf32>
    %275 = arith.addf %271, %274 : vector<8x128xf32>
    %c35 = arith.constant 35 : index
    %c0_185 = arith.constant 0 : index
    %c0_186 = arith.constant 0 : index
    %276 = vector.load %arg4[%c35, %c0_185, %c0_186] : memref<100x8x128xf32, #tpu.memory_space<vmem>>, vector<1x8x128xf32>
    %277 = vector.shape_cast %276 : vector<1x8x128xf32> to vector<8x128xf32>
    %278 = arith.mulf %277, %119 : vector<8x128xf32>
    %279 = arith.addf %275, %278 : vector<8x128xf32>
    %c36 = arith.constant 36 : index
    %c0_187 = arith.constant 0 : index
    %c0_188 = arith.constant 0 : index
    %280 = vector.load %arg4[%c36, %c0_187, %c0_188] : memref<100x8x128xf32, #tpu.memory_space<vmem>>, vector<1x8x128xf32>
    %281 = vector.shape_cast %280 : vector<1x8x128xf32> to vector<8x128xf32>
    %282 = arith.mulf %281, %121 : vector<8x128xf32>
    %283 = arith.addf %279, %282 : vector<8x128xf32>
    %c37 = arith.constant 37 : index
    %c0_189 = arith.constant 0 : index
    %c0_190 = arith.constant 0 : index
    %284 = vector.load %arg4[%c37, %c0_189, %c0_190] : memref<100x8x128xf32, #tpu.memory_space<vmem>>, vector<1x8x128xf32>
    %285 = vector.shape_cast %284 : vector<1x8x128xf32> to vector<8x128xf32>
    %286 = arith.mulf %285, %123 : vector<8x128xf32>
    %287 = arith.addf %283, %286 : vector<8x128xf32>
    %c38 = arith.constant 38 : index
    %c0_191 = arith.constant 0 : index
    %c0_192 = arith.constant 0 : index
    %288 = vector.load %arg4[%c38, %c0_191, %c0_192] : memref<100x8x128xf32, #tpu.memory_space<vmem>>, vector<1x8x128xf32>
    %289 = vector.shape_cast %288 : vector<1x8x128xf32> to vector<8x128xf32>
    %290 = arith.mulf %289, %125 : vector<8x128xf32>
    %291 = arith.addf %287, %290 : vector<8x128xf32>
    %c39 = arith.constant 39 : index
    %c0_193 = arith.constant 0 : index
    %c0_194 = arith.constant 0 : index
    %292 = vector.load %arg4[%c39, %c0_193, %c0_194] : memref<100x8x128xf32, #tpu.memory_space<vmem>>, vector<1x8x128xf32>
    %293 = vector.shape_cast %292 : vector<1x8x128xf32> to vector<8x128xf32>
    %294 = arith.mulf %293, %127 : vector<8x128xf32>
    %295 = arith.addf %291, %294 : vector<8x128xf32>
    %c4_195 = arith.constant 4 : index
    %c0_196 = arith.constant 0 : index
    %c0_197 = arith.constant 0 : index
    %296 = vector.load %arg5[%c4_195, %c0_196, %c0_197] : memref<10x8x128xf32, #tpu.memory_space<vmem>>, vector<1x8x128xf32>
    %297 = vector.shape_cast %296 : vector<1x8x128xf32> to vector<8x128xf32>
    %c40 = arith.constant 40 : index
    %c0_198 = arith.constant 0 : index
    %c0_199 = arith.constant 0 : index
    %298 = vector.load %arg4[%c40, %c0_198, %c0_199] : memref<100x8x128xf32, #tpu.memory_space<vmem>>, vector<1x8x128xf32>
    %299 = vector.shape_cast %298 : vector<1x8x128xf32> to vector<8x128xf32>
    %300 = arith.mulf %299, %109 : vector<8x128xf32>
    %301 = arith.addf %297, %300 : vector<8x128xf32>
    %c41 = arith.constant 41 : index
    %c0_200 = arith.constant 0 : index
    %c0_201 = arith.constant 0 : index
    %302 = vector.load %arg4[%c41, %c0_200, %c0_201] : memref<100x8x128xf32, #tpu.memory_space<vmem>>, vector<1x8x128xf32>
    %303 = vector.shape_cast %302 : vector<1x8x128xf32> to vector<8x128xf32>
    %304 = arith.mulf %303, %111 : vector<8x128xf32>
    %305 = arith.addf %301, %304 : vector<8x128xf32>
    %c42 = arith.constant 42 : index
    %c0_202 = arith.constant 0 : index
    %c0_203 = arith.constant 0 : index
    %306 = vector.load %arg4[%c42, %c0_202, %c0_203] : memref<100x8x128xf32, #tpu.memory_space<vmem>>, vector<1x8x128xf32>
    %307 = vector.shape_cast %306 : vector<1x8x128xf32> to vector<8x128xf32>
    %308 = arith.mulf %307, %113 : vector<8x128xf32>
    %309 = arith.addf %305, %308 : vector<8x128xf32>
    %c43 = arith.constant 43 : index
    %c0_204 = arith.constant 0 : index
    %c0_205 = arith.constant 0 : index
    %310 = vector.load %arg4[%c43, %c0_204, %c0_205] : memref<100x8x128xf32, #tpu.memory_space<vmem>>, vector<1x8x128xf32>
    %311 = vector.shape_cast %310 : vector<1x8x128xf32> to vector<8x128xf32>
    %312 = arith.mulf %311, %115 : vector<8x128xf32>
    %313 = arith.addf %309, %312 : vector<8x128xf32>
    %c44 = arith.constant 44 : index
    %c0_206 = arith.constant 0 : index
    %c0_207 = arith.constant 0 : index
    %314 = vector.load %arg4[%c44, %c0_206, %c0_207] : memref<100x8x128xf32, #tpu.memory_space<vmem>>, vector<1x8x128xf32>
    %315 = vector.shape_cast %314 : vector<1x8x128xf32> to vector<8x128xf32>
    %316 = arith.mulf %315, %117 : vector<8x128xf32>
    %317 = arith.addf %313, %316 : vector<8x128xf32>
    %c45 = arith.constant 45 : index
    %c0_208 = arith.constant 0 : index
    %c0_209 = arith.constant 0 : index
    %318 = vector.load %arg4[%c45, %c0_208, %c0_209] : memref<100x8x128xf32, #tpu.memory_space<vmem>>, vector<1x8x128xf32>
    %319 = vector.shape_cast %318 : vector<1x8x128xf32> to vector<8x128xf32>
    %320 = arith.mulf %319, %119 : vector<8x128xf32>
    %321 = arith.addf %317, %320 : vector<8x128xf32>
    %c46 = arith.constant 46 : index
    %c0_210 = arith.constant 0 : index
    %c0_211 = arith.constant 0 : index
    %322 = vector.load %arg4[%c46, %c0_210, %c0_211] : memref<100x8x128xf32, #tpu.memory_space<vmem>>, vector<1x8x128xf32>
    %323 = vector.shape_cast %322 : vector<1x8x128xf32> to vector<8x128xf32>
    %324 = arith.mulf %323, %121 : vector<8x128xf32>
    %325 = arith.addf %321, %324 : vector<8x128xf32>
    %c47 = arith.constant 47 : index
    %c0_212 = arith.constant 0 : index
    %c0_213 = arith.constant 0 : index
    %326 = vector.load %arg4[%c47, %c0_212, %c0_213] : memref<100x8x128xf32, #tpu.memory_space<vmem>>, vector<1x8x128xf32>
    %327 = vector.shape_cast %326 : vector<1x8x128xf32> to vector<8x128xf32>
    %328 = arith.mulf %327, %123 : vector<8x128xf32>
    %329 = arith.addf %325, %328 : vector<8x128xf32>
    %c48 = arith.constant 48 : index
    %c0_214 = arith.constant 0 : index
    %c0_215 = arith.constant 0 : index
    %330 = vector.load %arg4[%c48, %c0_214, %c0_215] : memref<100x8x128xf32, #tpu.memory_space<vmem>>, vector<1x8x128xf32>
    %331 = vector.shape_cast %330 : vector<1x8x128xf32> to vector<8x128xf32>
    %332 = arith.mulf %331, %125 : vector<8x128xf32>
    %333 = arith.addf %329, %332 : vector<8x128xf32>
    %c49 = arith.constant 49 : index
    %c0_216 = arith.constant 0 : index
    %c0_217 = arith.constant 0 : index
    %334 = vector.load %arg4[%c49, %c0_216, %c0_217] : memref<100x8x128xf32, #tpu.memory_space<vmem>>, vector<1x8x128xf32>
    %335 = vector.shape_cast %334 : vector<1x8x128xf32> to vector<8x128xf32>
    %336 = arith.mulf %335, %127 : vector<8x128xf32>
    %337 = arith.addf %333, %336 : vector<8x128xf32>
    %c5_218 = arith.constant 5 : index
    %c0_219 = arith.constant 0 : index
    %c0_220 = arith.constant 0 : index
    %338 = vector.load %arg5[%c5_218, %c0_219, %c0_220] : memref<10x8x128xf32, #tpu.memory_space<vmem>>, vector<1x8x128xf32>
    %339 = vector.shape_cast %338 : vector<1x8x128xf32> to vector<8x128xf32>
    %c50 = arith.constant 50 : index
    %c0_221 = arith.constant 0 : index
    %c0_222 = arith.constant 0 : index
    %340 = vector.load %arg4[%c50, %c0_221, %c0_222] : memref<100x8x128xf32, #tpu.memory_space<vmem>>, vector<1x8x128xf32>
    %341 = vector.shape_cast %340 : vector<1x8x128xf32> to vector<8x128xf32>
    %342 = arith.mulf %341, %109 : vector<8x128xf32>
    %343 = arith.addf %339, %342 : vector<8x128xf32>
    %c51 = arith.constant 51 : index
    %c0_223 = arith.constant 0 : index
    %c0_224 = arith.constant 0 : index
    %344 = vector.load %arg4[%c51, %c0_223, %c0_224] : memref<100x8x128xf32, #tpu.memory_space<vmem>>, vector<1x8x128xf32>
    %345 = vector.shape_cast %344 : vector<1x8x128xf32> to vector<8x128xf32>
    %346 = arith.mulf %345, %111 : vector<8x128xf32>
    %347 = arith.addf %343, %346 : vector<8x128xf32>
    %c52 = arith.constant 52 : index
    %c0_225 = arith.constant 0 : index
    %c0_226 = arith.constant 0 : index
    %348 = vector.load %arg4[%c52, %c0_225, %c0_226] : memref<100x8x128xf32, #tpu.memory_space<vmem>>, vector<1x8x128xf32>
    %349 = vector.shape_cast %348 : vector<1x8x128xf32> to vector<8x128xf32>
    %350 = arith.mulf %349, %113 : vector<8x128xf32>
    %351 = arith.addf %347, %350 : vector<8x128xf32>
    %c53 = arith.constant 53 : index
    %c0_227 = arith.constant 0 : index
    %c0_228 = arith.constant 0 : index
    %352 = vector.load %arg4[%c53, %c0_227, %c0_228] : memref<100x8x128xf32, #tpu.memory_space<vmem>>, vector<1x8x128xf32>
    %353 = vector.shape_cast %352 : vector<1x8x128xf32> to vector<8x128xf32>
    %354 = arith.mulf %353, %115 : vector<8x128xf32>
    %355 = arith.addf %351, %354 : vector<8x128xf32>
    %c54 = arith.constant 54 : index
    %c0_229 = arith.constant 0 : index
    %c0_230 = arith.constant 0 : index
    %356 = vector.load %arg4[%c54, %c0_229, %c0_230] : memref<100x8x128xf32, #tpu.memory_space<vmem>>, vector<1x8x128xf32>
    %357 = vector.shape_cast %356 : vector<1x8x128xf32> to vector<8x128xf32>
    %358 = arith.mulf %357, %117 : vector<8x128xf32>
    %359 = arith.addf %355, %358 : vector<8x128xf32>
    %c55 = arith.constant 55 : index
    %c0_231 = arith.constant 0 : index
    %c0_232 = arith.constant 0 : index
    %360 = vector.load %arg4[%c55, %c0_231, %c0_232] : memref<100x8x128xf32, #tpu.memory_space<vmem>>, vector<1x8x128xf32>
    %361 = vector.shape_cast %360 : vector<1x8x128xf32> to vector<8x128xf32>
    %362 = arith.mulf %361, %119 : vector<8x128xf32>
    %363 = arith.addf %359, %362 : vector<8x128xf32>
    %c56 = arith.constant 56 : index
    %c0_233 = arith.constant 0 : index
    %c0_234 = arith.constant 0 : index
    %364 = vector.load %arg4[%c56, %c0_233, %c0_234] : memref<100x8x128xf32, #tpu.memory_space<vmem>>, vector<1x8x128xf32>
    %365 = vector.shape_cast %364 : vector<1x8x128xf32> to vector<8x128xf32>
    %366 = arith.mulf %365, %121 : vector<8x128xf32>
    %367 = arith.addf %363, %366 : vector<8x128xf32>
    %c57 = arith.constant 57 : index
    %c0_235 = arith.constant 0 : index
    %c0_236 = arith.constant 0 : index
    %368 = vector.load %arg4[%c57, %c0_235, %c0_236] : memref<100x8x128xf32, #tpu.memory_space<vmem>>, vector<1x8x128xf32>
    %369 = vector.shape_cast %368 : vector<1x8x128xf32> to vector<8x128xf32>
    %370 = arith.mulf %369, %123 : vector<8x128xf32>
    %371 = arith.addf %367, %370 : vector<8x128xf32>
    %c58 = arith.constant 58 : index
    %c0_237 = arith.constant 0 : index
    %c0_238 = arith.constant 0 : index
    %372 = vector.load %arg4[%c58, %c0_237, %c0_238] : memref<100x8x128xf32, #tpu.memory_space<vmem>>, vector<1x8x128xf32>
    %373 = vector.shape_cast %372 : vector<1x8x128xf32> to vector<8x128xf32>
    %374 = arith.mulf %373, %125 : vector<8x128xf32>
    %375 = arith.addf %371, %374 : vector<8x128xf32>
    %c59 = arith.constant 59 : index
    %c0_239 = arith.constant 0 : index
    %c0_240 = arith.constant 0 : index
    %376 = vector.load %arg4[%c59, %c0_239, %c0_240] : memref<100x8x128xf32, #tpu.memory_space<vmem>>, vector<1x8x128xf32>
    %377 = vector.shape_cast %376 : vector<1x8x128xf32> to vector<8x128xf32>
    %378 = arith.mulf %377, %127 : vector<8x128xf32>
    %379 = arith.addf %375, %378 : vector<8x128xf32>
    %c6_241 = arith.constant 6 : index
    %c0_242 = arith.constant 0 : index
    %c0_243 = arith.constant 0 : index
    %380 = vector.load %arg5[%c6_241, %c0_242, %c0_243] : memref<10x8x128xf32, #tpu.memory_space<vmem>>, vector<1x8x128xf32>
    %381 = vector.shape_cast %380 : vector<1x8x128xf32> to vector<8x128xf32>
    %c60 = arith.constant 60 : index
    %c0_244 = arith.constant 0 : index
    %c0_245 = arith.constant 0 : index
    %382 = vector.load %arg4[%c60, %c0_244, %c0_245] : memref<100x8x128xf32, #tpu.memory_space<vmem>>, vector<1x8x128xf32>
    %383 = vector.shape_cast %382 : vector<1x8x128xf32> to vector<8x128xf32>
    %384 = arith.mulf %383, %109 : vector<8x128xf32>
    %385 = arith.addf %381, %384 : vector<8x128xf32>
    %c61 = arith.constant 61 : index
    %c0_246 = arith.constant 0 : index
    %c0_247 = arith.constant 0 : index
    %386 = vector.load %arg4[%c61, %c0_246, %c0_247] : memref<100x8x128xf32, #tpu.memory_space<vmem>>, vector<1x8x128xf32>
    %387 = vector.shape_cast %386 : vector<1x8x128xf32> to vector<8x128xf32>
    %388 = arith.mulf %387, %111 : vector<8x128xf32>
    %389 = arith.addf %385, %388 : vector<8x128xf32>
    %c62 = arith.constant 62 : index
    %c0_248 = arith.constant 0 : index
    %c0_249 = arith.constant 0 : index
    %390 = vector.load %arg4[%c62, %c0_248, %c0_249] : memref<100x8x128xf32, #tpu.memory_space<vmem>>, vector<1x8x128xf32>
    %391 = vector.shape_cast %390 : vector<1x8x128xf32> to vector<8x128xf32>
    %392 = arith.mulf %391, %113 : vector<8x128xf32>
    %393 = arith.addf %389, %392 : vector<8x128xf32>
    %c63 = arith.constant 63 : index
    %c0_250 = arith.constant 0 : index
    %c0_251 = arith.constant 0 : index
    %394 = vector.load %arg4[%c63, %c0_250, %c0_251] : memref<100x8x128xf32, #tpu.memory_space<vmem>>, vector<1x8x128xf32>
    %395 = vector.shape_cast %394 : vector<1x8x128xf32> to vector<8x128xf32>
    %396 = arith.mulf %395, %115 : vector<8x128xf32>
    %397 = arith.addf %393, %396 : vector<8x128xf32>
    %c64 = arith.constant 64 : index
    %c0_252 = arith.constant 0 : index
    %c0_253 = arith.constant 0 : index
    %398 = vector.load %arg4[%c64, %c0_252, %c0_253] : memref<100x8x128xf32, #tpu.memory_space<vmem>>, vector<1x8x128xf32>
    %399 = vector.shape_cast %398 : vector<1x8x128xf32> to vector<8x128xf32>
    %400 = arith.mulf %399, %117 : vector<8x128xf32>
    %401 = arith.addf %397, %400 : vector<8x128xf32>
    %c65 = arith.constant 65 : index
    %c0_254 = arith.constant 0 : index
    %c0_255 = arith.constant 0 : index
    %402 = vector.load %arg4[%c65, %c0_254, %c0_255] : memref<100x8x128xf32, #tpu.memory_space<vmem>>, vector<1x8x128xf32>
    %403 = vector.shape_cast %402 : vector<1x8x128xf32> to vector<8x128xf32>
    %404 = arith.mulf %403, %119 : vector<8x128xf32>
    %405 = arith.addf %401, %404 : vector<8x128xf32>
    %c66 = arith.constant 66 : index
    %c0_256 = arith.constant 0 : index
    %c0_257 = arith.constant 0 : index
    %406 = vector.load %arg4[%c66, %c0_256, %c0_257] : memref<100x8x128xf32, #tpu.memory_space<vmem>>, vector<1x8x128xf32>
    %407 = vector.shape_cast %406 : vector<1x8x128xf32> to vector<8x128xf32>
    %408 = arith.mulf %407, %121 : vector<8x128xf32>
    %409 = arith.addf %405, %408 : vector<8x128xf32>
    %c67 = arith.constant 67 : index
    %c0_258 = arith.constant 0 : index
    %c0_259 = arith.constant 0 : index
    %410 = vector.load %arg4[%c67, %c0_258, %c0_259] : memref<100x8x128xf32, #tpu.memory_space<vmem>>, vector<1x8x128xf32>
    %411 = vector.shape_cast %410 : vector<1x8x128xf32> to vector<8x128xf32>
    %412 = arith.mulf %411, %123 : vector<8x128xf32>
    %413 = arith.addf %409, %412 : vector<8x128xf32>
    %c68 = arith.constant 68 : index
    %c0_260 = arith.constant 0 : index
    %c0_261 = arith.constant 0 : index
    %414 = vector.load %arg4[%c68, %c0_260, %c0_261] : memref<100x8x128xf32, #tpu.memory_space<vmem>>, vector<1x8x128xf32>
    %415 = vector.shape_cast %414 : vector<1x8x128xf32> to vector<8x128xf32>
    %416 = arith.mulf %415, %125 : vector<8x128xf32>
    %417 = arith.addf %413, %416 : vector<8x128xf32>
    %c69 = arith.constant 69 : index
    %c0_262 = arith.constant 0 : index
    %c0_263 = arith.constant 0 : index
    %418 = vector.load %arg4[%c69, %c0_262, %c0_263] : memref<100x8x128xf32, #tpu.memory_space<vmem>>, vector<1x8x128xf32>
    %419 = vector.shape_cast %418 : vector<1x8x128xf32> to vector<8x128xf32>
    %420 = arith.mulf %419, %127 : vector<8x128xf32>
    %421 = arith.addf %417, %420 : vector<8x128xf32>
    %c7_264 = arith.constant 7 : index
    %c0_265 = arith.constant 0 : index
    %c0_266 = arith.constant 0 : index
    %422 = vector.load %arg5[%c7_264, %c0_265, %c0_266] : memref<10x8x128xf32, #tpu.memory_space<vmem>>, vector<1x8x128xf32>
    %423 = vector.shape_cast %422 : vector<1x8x128xf32> to vector<8x128xf32>
    %c70 = arith.constant 70 : index
    %c0_267 = arith.constant 0 : index
    %c0_268 = arith.constant 0 : index
    %424 = vector.load %arg4[%c70, %c0_267, %c0_268] : memref<100x8x128xf32, #tpu.memory_space<vmem>>, vector<1x8x128xf32>
    %425 = vector.shape_cast %424 : vector<1x8x128xf32> to vector<8x128xf32>
    %426 = arith.mulf %425, %109 : vector<8x128xf32>
    %427 = arith.addf %423, %426 : vector<8x128xf32>
    %c71 = arith.constant 71 : index
    %c0_269 = arith.constant 0 : index
    %c0_270 = arith.constant 0 : index
    %428 = vector.load %arg4[%c71, %c0_269, %c0_270] : memref<100x8x128xf32, #tpu.memory_space<vmem>>, vector<1x8x128xf32>
    %429 = vector.shape_cast %428 : vector<1x8x128xf32> to vector<8x128xf32>
    %430 = arith.mulf %429, %111 : vector<8x128xf32>
    %431 = arith.addf %427, %430 : vector<8x128xf32>
    %c72 = arith.constant 72 : index
    %c0_271 = arith.constant 0 : index
    %c0_272 = arith.constant 0 : index
    %432 = vector.load %arg4[%c72, %c0_271, %c0_272] : memref<100x8x128xf32, #tpu.memory_space<vmem>>, vector<1x8x128xf32>
    %433 = vector.shape_cast %432 : vector<1x8x128xf32> to vector<8x128xf32>
    %434 = arith.mulf %433, %113 : vector<8x128xf32>
    %435 = arith.addf %431, %434 : vector<8x128xf32>
    %c73 = arith.constant 73 : index
    %c0_273 = arith.constant 0 : index
    %c0_274 = arith.constant 0 : index
    %436 = vector.load %arg4[%c73, %c0_273, %c0_274] : memref<100x8x128xf32, #tpu.memory_space<vmem>>, vector<1x8x128xf32>
    %437 = vector.shape_cast %436 : vector<1x8x128xf32> to vector<8x128xf32>
    %438 = arith.mulf %437, %115 : vector<8x128xf32>
    %439 = arith.addf %435, %438 : vector<8x128xf32>
    %c74 = arith.constant 74 : index
    %c0_275 = arith.constant 0 : index
    %c0_276 = arith.constant 0 : index
    %440 = vector.load %arg4[%c74, %c0_275, %c0_276] : memref<100x8x128xf32, #tpu.memory_space<vmem>>, vector<1x8x128xf32>
    %441 = vector.shape_cast %440 : vector<1x8x128xf32> to vector<8x128xf32>
    %442 = arith.mulf %441, %117 : vector<8x128xf32>
    %443 = arith.addf %439, %442 : vector<8x128xf32>
    %c75 = arith.constant 75 : index
    %c0_277 = arith.constant 0 : index
    %c0_278 = arith.constant 0 : index
    %444 = vector.load %arg4[%c75, %c0_277, %c0_278] : memref<100x8x128xf32, #tpu.memory_space<vmem>>, vector<1x8x128xf32>
    %445 = vector.shape_cast %444 : vector<1x8x128xf32> to vector<8x128xf32>
    %446 = arith.mulf %445, %119 : vector<8x128xf32>
    %447 = arith.addf %443, %446 : vector<8x128xf32>
    %c76 = arith.constant 76 : index
    %c0_279 = arith.constant 0 : index
    %c0_280 = arith.constant 0 : index
    %448 = vector.load %arg4[%c76, %c0_279, %c0_280] : memref<100x8x128xf32, #tpu.memory_space<vmem>>, vector<1x8x128xf32>
    %449 = vector.shape_cast %448 : vector<1x8x128xf32> to vector<8x128xf32>
    %450 = arith.mulf %449, %121 : vector<8x128xf32>
    %451 = arith.addf %447, %450 : vector<8x128xf32>
    %c77 = arith.constant 77 : index
    %c0_281 = arith.constant 0 : index
    %c0_282 = arith.constant 0 : index
    %452 = vector.load %arg4[%c77, %c0_281, %c0_282] : memref<100x8x128xf32, #tpu.memory_space<vmem>>, vector<1x8x128xf32>
    %453 = vector.shape_cast %452 : vector<1x8x128xf32> to vector<8x128xf32>
    %454 = arith.mulf %453, %123 : vector<8x128xf32>
    %455 = arith.addf %451, %454 : vector<8x128xf32>
    %c78 = arith.constant 78 : index
    %c0_283 = arith.constant 0 : index
    %c0_284 = arith.constant 0 : index
    %456 = vector.load %arg4[%c78, %c0_283, %c0_284] : memref<100x8x128xf32, #tpu.memory_space<vmem>>, vector<1x8x128xf32>
    %457 = vector.shape_cast %456 : vector<1x8x128xf32> to vector<8x128xf32>
    %458 = arith.mulf %457, %125 : vector<8x128xf32>
    %459 = arith.addf %455, %458 : vector<8x128xf32>
    %c79 = arith.constant 79 : index
    %c0_285 = arith.constant 0 : index
    %c0_286 = arith.constant 0 : index
    %460 = vector.load %arg4[%c79, %c0_285, %c0_286] : memref<100x8x128xf32, #tpu.memory_space<vmem>>, vector<1x8x128xf32>
    %461 = vector.shape_cast %460 : vector<1x8x128xf32> to vector<8x128xf32>
    %462 = arith.mulf %461, %127 : vector<8x128xf32>
    %463 = arith.addf %459, %462 : vector<8x128xf32>
    %c8_287 = arith.constant 8 : index
    %c0_288 = arith.constant 0 : index
    %c0_289 = arith.constant 0 : index
    %464 = vector.load %arg5[%c8_287, %c0_288, %c0_289] : memref<10x8x128xf32, #tpu.memory_space<vmem>>, vector<1x8x128xf32>
    %465 = vector.shape_cast %464 : vector<1x8x128xf32> to vector<8x128xf32>
    %c80 = arith.constant 80 : index
    %c0_290 = arith.constant 0 : index
    %c0_291 = arith.constant 0 : index
    %466 = vector.load %arg4[%c80, %c0_290, %c0_291] : memref<100x8x128xf32, #tpu.memory_space<vmem>>, vector<1x8x128xf32>
    %467 = vector.shape_cast %466 : vector<1x8x128xf32> to vector<8x128xf32>
    %468 = arith.mulf %467, %109 : vector<8x128xf32>
    %469 = arith.addf %465, %468 : vector<8x128xf32>
    %c81 = arith.constant 81 : index
    %c0_292 = arith.constant 0 : index
    %c0_293 = arith.constant 0 : index
    %470 = vector.load %arg4[%c81, %c0_292, %c0_293] : memref<100x8x128xf32, #tpu.memory_space<vmem>>, vector<1x8x128xf32>
    %471 = vector.shape_cast %470 : vector<1x8x128xf32> to vector<8x128xf32>
    %472 = arith.mulf %471, %111 : vector<8x128xf32>
    %473 = arith.addf %469, %472 : vector<8x128xf32>
    %c82 = arith.constant 82 : index
    %c0_294 = arith.constant 0 : index
    %c0_295 = arith.constant 0 : index
    %474 = vector.load %arg4[%c82, %c0_294, %c0_295] : memref<100x8x128xf32, #tpu.memory_space<vmem>>, vector<1x8x128xf32>
    %475 = vector.shape_cast %474 : vector<1x8x128xf32> to vector<8x128xf32>
    %476 = arith.mulf %475, %113 : vector<8x128xf32>
    %477 = arith.addf %473, %476 : vector<8x128xf32>
    %c83 = arith.constant 83 : index
    %c0_296 = arith.constant 0 : index
    %c0_297 = arith.constant 0 : index
    %478 = vector.load %arg4[%c83, %c0_296, %c0_297] : memref<100x8x128xf32, #tpu.memory_space<vmem>>, vector<1x8x128xf32>
    %479 = vector.shape_cast %478 : vector<1x8x128xf32> to vector<8x128xf32>
    %480 = arith.mulf %479, %115 : vector<8x128xf32>
    %481 = arith.addf %477, %480 : vector<8x128xf32>
    %c84 = arith.constant 84 : index
    %c0_298 = arith.constant 0 : index
    %c0_299 = arith.constant 0 : index
    %482 = vector.load %arg4[%c84, %c0_298, %c0_299] : memref<100x8x128xf32, #tpu.memory_space<vmem>>, vector<1x8x128xf32>
    %483 = vector.shape_cast %482 : vector<1x8x128xf32> to vector<8x128xf32>
    %484 = arith.mulf %483, %117 : vector<8x128xf32>
    %485 = arith.addf %481, %484 : vector<8x128xf32>
    %c85 = arith.constant 85 : index
    %c0_300 = arith.constant 0 : index
    %c0_301 = arith.constant 0 : index
    %486 = vector.load %arg4[%c85, %c0_300, %c0_301] : memref<100x8x128xf32, #tpu.memory_space<vmem>>, vector<1x8x128xf32>
    %487 = vector.shape_cast %486 : vector<1x8x128xf32> to vector<8x128xf32>
    %488 = arith.mulf %487, %119 : vector<8x128xf32>
    %489 = arith.addf %485, %488 : vector<8x128xf32>
    %c86 = arith.constant 86 : index
    %c0_302 = arith.constant 0 : index
    %c0_303 = arith.constant 0 : index
    %490 = vector.load %arg4[%c86, %c0_302, %c0_303] : memref<100x8x128xf32, #tpu.memory_space<vmem>>, vector<1x8x128xf32>
    %491 = vector.shape_cast %490 : vector<1x8x128xf32> to vector<8x128xf32>
    %492 = arith.mulf %491, %121 : vector<8x128xf32>
    %493 = arith.addf %489, %492 : vector<8x128xf32>
    %c87 = arith.constant 87 : index
    %c0_304 = arith.constant 0 : index
    %c0_305 = arith.constant 0 : index
    %494 = vector.load %arg4[%c87, %c0_304, %c0_305] : memref<100x8x128xf32, #tpu.memory_space<vmem>>, vector<1x8x128xf32>
    %495 = vector.shape_cast %494 : vector<1x8x128xf32> to vector<8x128xf32>
    %496 = arith.mulf %495, %123 : vector<8x128xf32>
    %497 = arith.addf %493, %496 : vector<8x128xf32>
    %c88 = arith.constant 88 : index
    %c0_306 = arith.constant 0 : index
    %c0_307 = arith.constant 0 : index
    %498 = vector.load %arg4[%c88, %c0_306, %c0_307] : memref<100x8x128xf32, #tpu.memory_space<vmem>>, vector<1x8x128xf32>
    %499 = vector.shape_cast %498 : vector<1x8x128xf32> to vector<8x128xf32>
    %500 = arith.mulf %499, %125 : vector<8x128xf32>
    %501 = arith.addf %497, %500 : vector<8x128xf32>
    %c89 = arith.constant 89 : index
    %c0_308 = arith.constant 0 : index
    %c0_309 = arith.constant 0 : index
    %502 = vector.load %arg4[%c89, %c0_308, %c0_309] : memref<100x8x128xf32, #tpu.memory_space<vmem>>, vector<1x8x128xf32>
    %503 = vector.shape_cast %502 : vector<1x8x128xf32> to vector<8x128xf32>
    %504 = arith.mulf %503, %127 : vector<8x128xf32>
    %505 = arith.addf %501, %504 : vector<8x128xf32>
    %c9_310 = arith.constant 9 : index
    %c0_311 = arith.constant 0 : index
    %c0_312 = arith.constant 0 : index
    %506 = vector.load %arg5[%c9_310, %c0_311, %c0_312] : memref<10x8x128xf32, #tpu.memory_space<vmem>>, vector<1x8x128xf32>
    %507 = vector.shape_cast %506 : vector<1x8x128xf32> to vector<8x128xf32>
    %c90 = arith.constant 90 : index
    %c0_313 = arith.constant 0 : index
    %c0_314 = arith.constant 0 : index
    %508 = vector.load %arg4[%c90, %c0_313, %c0_314] : memref<100x8x128xf32, #tpu.memory_space<vmem>>, vector<1x8x128xf32>
    %509 = vector.shape_cast %508 : vector<1x8x128xf32> to vector<8x128xf32>
    %510 = arith.mulf %509, %109 : vector<8x128xf32>
    %511 = arith.addf %507, %510 : vector<8x128xf32>
    %c91 = arith.constant 91 : index
    %c0_315 = arith.constant 0 : index
    %c0_316 = arith.constant 0 : index
    %512 = vector.load %arg4[%c91, %c0_315, %c0_316] : memref<100x8x128xf32, #tpu.memory_space<vmem>>, vector<1x8x128xf32>
    %513 = vector.shape_cast %512 : vector<1x8x128xf32> to vector<8x128xf32>
    %514 = arith.mulf %513, %111 : vector<8x128xf32>
    %515 = arith.addf %511, %514 : vector<8x128xf32>
    %c92 = arith.constant 92 : index
    %c0_317 = arith.constant 0 : index
    %c0_318 = arith.constant 0 : index
    %516 = vector.load %arg4[%c92, %c0_317, %c0_318] : memref<100x8x128xf32, #tpu.memory_space<vmem>>, vector<1x8x128xf32>
    %517 = vector.shape_cast %516 : vector<1x8x128xf32> to vector<8x128xf32>
    %518 = arith.mulf %517, %113 : vector<8x128xf32>
    %519 = arith.addf %515, %518 : vector<8x128xf32>
    %c93 = arith.constant 93 : index
    %c0_319 = arith.constant 0 : index
    %c0_320 = arith.constant 0 : index
    %520 = vector.load %arg4[%c93, %c0_319, %c0_320] : memref<100x8x128xf32, #tpu.memory_space<vmem>>, vector<1x8x128xf32>
    %521 = vector.shape_cast %520 : vector<1x8x128xf32> to vector<8x128xf32>
    %522 = arith.mulf %521, %115 : vector<8x128xf32>
    %523 = arith.addf %519, %522 : vector<8x128xf32>
    %c94 = arith.constant 94 : index
    %c0_321 = arith.constant 0 : index
    %c0_322 = arith.constant 0 : index
    %524 = vector.load %arg4[%c94, %c0_321, %c0_322] : memref<100x8x128xf32, #tpu.memory_space<vmem>>, vector<1x8x128xf32>
    %525 = vector.shape_cast %524 : vector<1x8x128xf32> to vector<8x128xf32>
    %526 = arith.mulf %525, %117 : vector<8x128xf32>
    %527 = arith.addf %523, %526 : vector<8x128xf32>
    %c95 = arith.constant 95 : index
    %c0_323 = arith.constant 0 : index
    %c0_324 = arith.constant 0 : index
    %528 = vector.load %arg4[%c95, %c0_323, %c0_324] : memref<100x8x128xf32, #tpu.memory_space<vmem>>, vector<1x8x128xf32>
    %529 = vector.shape_cast %528 : vector<1x8x128xf32> to vector<8x128xf32>
    %530 = arith.mulf %529, %119 : vector<8x128xf32>
    %531 = arith.addf %527, %530 : vector<8x128xf32>
    %c96 = arith.constant 96 : index
    %c0_325 = arith.constant 0 : index
    %c0_326 = arith.constant 0 : index
    %532 = vector.load %arg4[%c96, %c0_325, %c0_326] : memref<100x8x128xf32, #tpu.memory_space<vmem>>, vector<1x8x128xf32>
    %533 = vector.shape_cast %532 : vector<1x8x128xf32> to vector<8x128xf32>
    %534 = arith.mulf %533, %121 : vector<8x128xf32>
    %535 = arith.addf %531, %534 : vector<8x128xf32>
    %c97 = arith.constant 97 : index
    %c0_327 = arith.constant 0 : index
    %c0_328 = arith.constant 0 : index
    %536 = vector.load %arg4[%c97, %c0_327, %c0_328] : memref<100x8x128xf32, #tpu.memory_space<vmem>>, vector<1x8x128xf32>
    %537 = vector.shape_cast %536 : vector<1x8x128xf32> to vector<8x128xf32>
    %538 = arith.mulf %537, %123 : vector<8x128xf32>
    %539 = arith.addf %535, %538 : vector<8x128xf32>
    %c98 = arith.constant 98 : index
    %c0_329 = arith.constant 0 : index
    %c0_330 = arith.constant 0 : index
    %540 = vector.load %arg4[%c98, %c0_329, %c0_330] : memref<100x8x128xf32, #tpu.memory_space<vmem>>, vector<1x8x128xf32>
    %541 = vector.shape_cast %540 : vector<1x8x128xf32> to vector<8x128xf32>
    %542 = arith.mulf %541, %125 : vector<8x128xf32>
    %543 = arith.addf %539, %542 : vector<8x128xf32>
    %c99 = arith.constant 99 : index
    %c0_331 = arith.constant 0 : index
    %c0_332 = arith.constant 0 : index
    %544 = vector.load %arg4[%c99, %c0_331, %c0_332] : memref<100x8x128xf32, #tpu.memory_space<vmem>>, vector<1x8x128xf32>
    %545 = vector.shape_cast %544 : vector<1x8x128xf32> to vector<8x128xf32>
    %546 = arith.mulf %545, %127 : vector<8x128xf32>
    %547 = arith.addf %543, %546 : vector<8x128xf32>
    %cst_333 = arith.constant 0.000000e+00 : f32
    %548 = vector.broadcast %cst_333 : f32 to vector<8x128xf32>
    %549 = arith.maximumf %169, %548 : vector<8x128xf32>
    %cst_334 = arith.constant 0.000000e+00 : f32
    %550 = vector.broadcast %cst_334 : f32 to vector<8x128xf32>
    %551 = arith.maximumf %211, %550 : vector<8x128xf32>
    %cst_335 = arith.constant 0.000000e+00 : f32
    %552 = vector.broadcast %cst_335 : f32 to vector<8x128xf32>
    %553 = arith.maximumf %253, %552 : vector<8x128xf32>
    %cst_336 = arith.constant 0.000000e+00 : f32
    %554 = vector.broadcast %cst_336 : f32 to vector<8x128xf32>
    %555 = arith.maximumf %295, %554 : vector<8x128xf32>
    %cst_337 = arith.constant 0.000000e+00 : f32
    %556 = vector.broadcast %cst_337 : f32 to vector<8x128xf32>
    %557 = arith.maximumf %337, %556 : vector<8x128xf32>
    %cst_338 = arith.constant 0.000000e+00 : f32
    %558 = vector.broadcast %cst_338 : f32 to vector<8x128xf32>
    %559 = arith.maximumf %379, %558 : vector<8x128xf32>
    %cst_339 = arith.constant 0.000000e+00 : f32
    %560 = vector.broadcast %cst_339 : f32 to vector<8x128xf32>
    %561 = arith.maximumf %421, %560 : vector<8x128xf32>
    %cst_340 = arith.constant 0.000000e+00 : f32
    %562 = vector.broadcast %cst_340 : f32 to vector<8x128xf32>
    %563 = arith.maximumf %463, %562 : vector<8x128xf32>
    %cst_341 = arith.constant 0.000000e+00 : f32
    %564 = vector.broadcast %cst_341 : f32 to vector<8x128xf32>
    %565 = arith.maximumf %505, %564 : vector<8x128xf32>
    %cst_342 = arith.constant 0.000000e+00 : f32
    %566 = vector.broadcast %cst_342 : f32 to vector<8x128xf32>
    %567 = arith.maximumf %547, %566 : vector<8x128xf32>
    %c0_343 = arith.constant 0 : index
    %c0_344 = arith.constant 0 : index
    %c0_345 = arith.constant 0 : index
    %568 = vector.load %arg7[%c0_343, %c0_344, %c0_345] : memref<1x8x128xf32, #tpu.memory_space<vmem>>, vector<1x8x128xf32>
    %569 = vector.shape_cast %568 : vector<1x8x128xf32> to vector<8x128xf32>
    %c0_346 = arith.constant 0 : index
    %c0_347 = arith.constant 0 : index
    %c0_348 = arith.constant 0 : index
    %570 = vector.load %arg6[%c0_346, %c0_347, %c0_348] : memref<10x8x128xf32, #tpu.memory_space<vmem>>, vector<1x8x128xf32>
    %571 = vector.shape_cast %570 : vector<1x8x128xf32> to vector<8x128xf32>
    %572 = arith.mulf %571, %549 : vector<8x128xf32>
    %573 = arith.addf %569, %572 : vector<8x128xf32>
    %c1_349 = arith.constant 1 : index
    %c0_350 = arith.constant 0 : index
    %c0_351 = arith.constant 0 : index
    %574 = vector.load %arg6[%c1_349, %c0_350, %c0_351] : memref<10x8x128xf32, #tpu.memory_space<vmem>>, vector<1x8x128xf32>
    %575 = vector.shape_cast %574 : vector<1x8x128xf32> to vector<8x128xf32>
    %576 = arith.mulf %575, %551 : vector<8x128xf32>
    %577 = arith.addf %573, %576 : vector<8x128xf32>
    %c2_352 = arith.constant 2 : index
    %c0_353 = arith.constant 0 : index
    %c0_354 = arith.constant 0 : index
    %578 = vector.load %arg6[%c2_352, %c0_353, %c0_354] : memref<10x8x128xf32, #tpu.memory_space<vmem>>, vector<1x8x128xf32>
    %579 = vector.shape_cast %578 : vector<1x8x128xf32> to vector<8x128xf32>
    %580 = arith.mulf %579, %553 : vector<8x128xf32>
    %581 = arith.addf %577, %580 : vector<8x128xf32>
    %c3_355 = arith.constant 3 : index
    %c0_356 = arith.constant 0 : index
    %c0_357 = arith.constant 0 : index
    %582 = vector.load %arg6[%c3_355, %c0_356, %c0_357] : memref<10x8x128xf32, #tpu.memory_space<vmem>>, vector<1x8x128xf32>
    %583 = vector.shape_cast %582 : vector<1x8x128xf32> to vector<8x128xf32>
    %584 = arith.mulf %583, %555 : vector<8x128xf32>
    %585 = arith.addf %581, %584 : vector<8x128xf32>
    %c4_358 = arith.constant 4 : index
    %c0_359 = arith.constant 0 : index
    %c0_360 = arith.constant 0 : index
    %586 = vector.load %arg6[%c4_358, %c0_359, %c0_360] : memref<10x8x128xf32, #tpu.memory_space<vmem>>, vector<1x8x128xf32>
    %587 = vector.shape_cast %586 : vector<1x8x128xf32> to vector<8x128xf32>
    %588 = arith.mulf %587, %557 : vector<8x128xf32>
    %589 = arith.addf %585, %588 : vector<8x128xf32>
    %c5_361 = arith.constant 5 : index
    %c0_362 = arith.constant 0 : index
    %c0_363 = arith.constant 0 : index
    %590 = vector.load %arg6[%c5_361, %c0_362, %c0_363] : memref<10x8x128xf32, #tpu.memory_space<vmem>>, vector<1x8x128xf32>
    %591 = vector.shape_cast %590 : vector<1x8x128xf32> to vector<8x128xf32>
    %592 = arith.mulf %591, %559 : vector<8x128xf32>
    %593 = arith.addf %589, %592 : vector<8x128xf32>
    %c6_364 = arith.constant 6 : index
    %c0_365 = arith.constant 0 : index
    %c0_366 = arith.constant 0 : index
    %594 = vector.load %arg6[%c6_364, %c0_365, %c0_366] : memref<10x8x128xf32, #tpu.memory_space<vmem>>, vector<1x8x128xf32>
    %595 = vector.shape_cast %594 : vector<1x8x128xf32> to vector<8x128xf32>
    %596 = arith.mulf %595, %561 : vector<8x128xf32>
    %597 = arith.addf %593, %596 : vector<8x128xf32>
    %c7_367 = arith.constant 7 : index
    %c0_368 = arith.constant 0 : index
    %c0_369 = arith.constant 0 : index
    %598 = vector.load %arg6[%c7_367, %c0_368, %c0_369] : memref<10x8x128xf32, #tpu.memory_space<vmem>>, vector<1x8x128xf32>
    %599 = vector.shape_cast %598 : vector<1x8x128xf32> to vector<8x128xf32>
    %600 = arith.mulf %599, %563 : vector<8x128xf32>
    %601 = arith.addf %597, %600 : vector<8x128xf32>
    %c8_370 = arith.constant 8 : index
    %c0_371 = arith.constant 0 : index
    %c0_372 = arith.constant 0 : index
    %602 = vector.load %arg6[%c8_370, %c0_371, %c0_372] : memref<10x8x128xf32, #tpu.memory_space<vmem>>, vector<1x8x128xf32>
    %603 = vector.shape_cast %602 : vector<1x8x128xf32> to vector<8x128xf32>
    %604 = arith.mulf %603, %565 : vector<8x128xf32>
    %605 = arith.addf %601, %604 : vector<8x128xf32>
    %c9_373 = arith.constant 9 : index
    %c0_374 = arith.constant 0 : index
    %c0_375 = arith.constant 0 : index
    %606 = vector.load %arg6[%c9_373, %c0_374, %c0_375] : memref<10x8x128xf32, #tpu.memory_space<vmem>>, vector<1x8x128xf32>
    %607 = vector.shape_cast %606 : vector<1x8x128xf32> to vector<8x128xf32>
    %608 = arith.mulf %607, %567 : vector<8x128xf32>
    %609 = arith.addf %605, %608 : vector<8x128xf32>
    %cst_376 = arith.constant 5.000000e-01 : f32
    %610 = vector.broadcast %cst_376 : f32 to vector<8x128xf32>
    %611 = arith.mulf %610, %609 : vector<8x128xf32>
    %612 = math.tanh %611 : vector<8x128xf32>
    %cst_377 = arith.constant 1.000000e+00 : f32
    %613 = vector.broadcast %cst_377 : f32 to vector<8x128xf32>
    %614 = arith.addf %612, %613 : vector<8x128xf32>
    %cst_378 = arith.constant 5.000000e-01 : f32
    %615 = vector.broadcast %cst_378 : f32 to vector<8x128xf32>
    %616 = arith.mulf %615, %614 : vector<8x128xf32>
    %617 = arith.index_cast %1 : i32 to index
    %c0_379 = arith.constant 0 : index
    %618 = vector.load %arg8[%617, %c0_379] : memref<8x128xf32, #tpu.memory_space<vmem>>, vector<8x128xf32>
    tpu.vector_store %arg8[%617, %c0_379], %616 {strides = array<i32>} : memref<8x128xf32, #tpu.memory_space<vmem>>, vector<8x128xf32>,
    %c1_i32 = arith.constant 1 : i32
    return
  }
  func.func @transform_0(%arg0: i32) -> (i32, i32, i32) {
    %c0_i32 = arith.constant 0 : i32
    %c0_i32_0 = arith.constant 0 : i32
    %c0_i32_1 = arith.constant 0 : i32
    return %c0_i32, %arg0, %c0_i32_0 : i32, i32, i32
  }
  func.func @transform_1(%arg0: i32) -> (i32, i32, i32) {
    %c0_i32 = arith.constant 0 : i32
    %c0_i32_0 = arith.constant 0 : i32
    %c0_i32_1 = arith.constant 0 : i32
    %c0_i32_2 = arith.constant 0 : i32
    return %c0_i32, %c0_i32_0, %c0_i32_1 : i32, i32, i32
  }
  func.func @transform_2(%arg0: i32) -> (i32, i32, i32) {
    %c0_i32 = arith.constant 0 : i32
    %c0_i32_0 = arith.constant 0 : i32
    %c0_i32_1 = arith.constant 0 : i32
    %c0_i32_2 = arith.constant 0 : i32
    return %c0_i32, %c0_i32_0, %c0_i32_1 : i32, i32, i32
  }
  func.func @transform_3(%arg0: i32) -> (i32, i32, i32) {
    %c0_i32 = arith.constant 0 : i32
    %c0_i32_0 = arith.constant 0 : i32
    %c0_i32_1 = arith.constant 0 : i32
    %c0_i32_2 = arith.constant 0 : i32
    return %c0_i32, %c0_i32_0, %c0_i32_1 : i32, i32, i32
  }
  func.func @transform_4(%arg0: i32) -> (i32, i32, i32) {
    %c0_i32 = arith.constant 0 : i32
    %c0_i32_0 = arith.constant 0 : i32
    %c0_i32_1 = arith.constant 0 : i32
    %c0_i32_2 = arith.constant 0 : i32
    return %c0_i32, %c0_i32_0, %c0_i32_1 : i32, i32, i32
  }
  func.func @transform_5(%arg0: i32) -> (i32, i32, i32) {
    %c0_i32 = arith.constant 0 : i32
    %c0_i32_0 = arith.constant 0 : i32
    %c0_i32_1 = arith.constant 0 : i32
    %c0_i32_2 = arith.constant 0 : i32
    return %c0_i32, %c0_i32_0, %c0_i32_1 : i32, i32, i32
  }
  func.func @transform_6(%arg0: i32) -> (i32, i32, i32) {
    %c0_i32 = arith.constant 0 : i32
    %c0_i32_0 = arith.constant 0 : i32
    %c0_i32_1 = arith.constant 0 : i32
    %c0_i32_2 = arith.constant 0 : i32
    return %c0_i32, %c0_i32_0, %c0_i32_1 : i32, i32, i32
  }
  func.func @transform_7(%arg0: i32) -> (i32, i32) {
    %c0_i32 = arith.constant 0 : i32
    %c0_i32_0 = arith.constant 0 : i32
    return %arg0, %c0_i32 : i32, i32
  }
}

</mosaic_0001>

<bundles_post_ra>
// kernel: tpu_custom_call.1
= control target key start
LH: loop header
LB: loop body
LE: loop exit
PB: predicated region body
PF: predicated region fallthrough
CT: control target
= control target key end

     0   :  { %s2017_s0 = inlined_call_operand.hbm [shape: f32[2,24,128], index: 0, kind: input, shape index: {}]   ;;  %s2018_s1 = inlined_call_operand.hbm [shape: f32[20,8,128], index: 1, kind: input, shape index: {}]   ;;  %s2019_s2 = inlined_call_operand.hbm [shape: f32[10,8,128], index: 2, kind: input, shape index: {}]   ;;  %s2020_s3 = inlined_call_operand.hbm [shape: f32[100,8,128], index: 3, kind: input, shape index: {}]   ;;  %s2021_s4 = inlined_call_operand.hbm [shape: f32[10,8,128], index: 4, kind: input, shape index: {}]   ;;  %s2022_s5 = inlined_call_operand.hbm [shape: f32[10,8,128], index: 5, kind: input, shape index: {}]   ;;  %s2023_s6 = inlined_call_operand.vmem [shape: f32[1,8,128], index: 6, kind: input, shape index: {}]   ;;  %s2024_s7 = inlined_call_operand.hbm [shape: f32[24,128], index: 7, kind: output, shape index: {}]  }
   0x1   :  { %2029 = sst [smem:[#allocation20_spill]] %s2018_s1 }
   0x2   :  { %12 = vsyncpa [#allocation3], 0 }
   0x3   :  { %14 = vsyncpa [#allocation3 + $0x1], 0 }
   0x4   :  { %15 = vsyncpa [#allocation6], 0 }
   0x5   :  { %16 = vsyncpa [#allocation9], 0 }
   0x6   :  { %17 = vsyncpa [#allocation12], 0 }
   0x7   :  { %18 = vsyncpa [#allocation4], 0 }
   0x8   :  { %20 = vsyncpa [#allocation4 + $0x1], 0  ;;  %s1512_s24 = smov 0   ;;  %s1514_s25 = smov 0  }
   0x9   :  { %s1516_s26 = smov 0   ;;  %s1518_s27 = smov 0  }
   0xa LB: > { %s1533_s28 = sadd.s32 4294967295, %s1460_s27   ;;  %s1087_s29 = sadd.s32 4294967294, %s1460_s27   ;;  %s1460_s27 = sphi %s1518_s27, %s2053_s27   ;;  %s1456_s26 = sphi %s1516_s26, %s2052_s26   ;;  %s1452_s25 = sphi %s1514_s25, %s2051_s25   ;;  %s1448_s24 = sphi %s1512_s24, %s2050_s24  }
   0xb   : > { %p46_p0 = scmp.ne.s32.totalorder %s1452_s25, %s1448_s24  ;;  %p2025_p1 = scmp.eq.s32.totalorder %s1533_s28, 0 }
   0xc   : > { %p202_p3 = scmp.eq.s32.totalorder %s1087_s29, 2  ;;  %p1088_p5 = scmp.ge.s32.totalorder %s1460_s27, 1 }
   0xd   : > { %p1542_p4 = por %p2025_p1, %p46_p0  ;;  %p209_p7 = scmp.lt.s32.totalorder %s1460_s27, 4 }
   0xe   : > { %p1547_p6 = por %p202_p3, %p46_p0  ;;  %s1462_s10 = smov [#allocation5]  }
   0xf   : > { %s2030_s30 = scalar_select %p1542_p4, 1, 0 }
  0x10   : > { %s2031_s8 = scalar_select %p1547_p6, 1, 0 }
  0x11   : > { %p1552_p8 = pnand %p1088_p5, %p209_p7  ;;  %s221_s11 = sshll.u32 %s1462_s10, 4  ;;  %s1556_s11 = int_to_ptr.vmem [resolvable:$true] %s221_s11 }
  0x12   : > { %2032 = sst [smem:[#allocation19_spill]] %s2031_s8  ;;  %s1463_s13 = smov [#allocation8]  }
  0x13   : > { %s2033_s9 = scalar_select %p1552_p8, 1, 0 }
  0x14   : > { %p1134_p9 = pneg %p1552_p8  ;;  %s247_s14 = sshll.u32 %s1463_s13, 4  ;;  %s1566_s14 = int_to_ptr.vmem [resolvable:$true] %s247_s14 }
  0x15   : > { %s1464_s15 = smov [#allocation7]   ;;  %s2035_s1 = sld [smem:[#allocation20_spill]] }
  0x16   : > { %p1562_p10 = pnand %p1134_p9, %p2025_p1  ;;  %s1568_s16 = sshll.u32 %s1464_s15, 4  ;;  %s235_s16 = int_to_ptr.vmem [resolvable:$true] %s1568_s16 }
  0x18   : > { %p1578_p12 = pneg %p1562_p10 }
  0x1b   : > { %s1212_s19 = scalar_lea.hbm %s2035_s1, 2560 }
  0x1c   : > { %p1213_p11 = scmp.ne.s32.totalorder %s2035_s1, %s1212_s19  ;;  %p1219_p3 = scmp.lt.u32.totalorder %s1212_s19, %s2035_s1 }
  0x1e   : > { %p1215_p13 = pnand %p1578_p12, %p1213_p11 }
  0x20   : > { %p1216_p0 = pneg %p1215_p13 }
  0x22   : > { %p1221_p5 = pnand %p1219_p3, %p1216_p0 }
  0x24   : > { %1224 = shalt.err (!%p1221_p5)
}
  0x25   : > { %s1225_s10 = scalar_lea.vmem %s1556_s11, 2560  ;;  %p1233_p2 = scmp.lt.s32.totalorder %s1556_s11, %s1556_s11 }
  0x26   : > { %p1226_p7 = scmp.ne.s32.totalorder %s1556_s11, %s1225_s10  ;;  %p1234_p6 = scmp.lt.s32.totalorder %s1225_s10, %s1225_s10 }
  0x28   : > { %p1228_p9 = pnand %p1226_p7, %p1578_p12  ;;  %p1235_p11 = por %p1234_p6, %p1233_p2 }
  0x2a   : > { %p1229_p1 = pneg %p1228_p9 }
  0x2c   : > { %p1236_p13 = pnand %p1235_p11, %p1229_p1 }
  0x2e   : > { %1239 = shalt.err (!%p1236_p13)
}
  0x2f   : > { %s1465_s13 = smov 128   ;;  %s1466_s15 = smov 8  }
  0x30   : > { %1137 = dma.hbm_to_vmem [thread:$0]  (!%p1562_p10), %s2035_s1, 2560, %s1556_s11, [#allocation6], %s1465_s13, %s1465_s13, %s1466_s15  }
  0x31   : > { %s1240_s21 = scalar_lea.hbm %s2020_s3, 12800 }
  0x32   : > { %p1241_p1 = scmp.ne.s32.totalorder %s2020_s3, %s1240_s21  ;;  %p1247_p0 = scmp.lt.u32.totalorder %s1240_s21, %s2020_s3 }
  0x34   : > { %p1243_p2 = pnand %p1241_p1, %p1578_p12 }
  0x36   : > { %p1244_p6 = pneg %p1243_p2 }
  0x38   : > { %p1249_p3 = pnand %p1247_p0, %p1244_p6 }
  0x3a   : > { %1252 = shalt.err (!%p1249_p3)
}
  0x3b   : > { %s1253_s11 = scalar_lea.vmem %s1566_s14, 12800  ;;  %p1261_p11 = scmp.lt.s32.totalorder %s1566_s14, %s1566_s14 }
  0x3c   : > { %p1254_p5 = scmp.ne.s32.totalorder %s1566_s14, %s1253_s11  ;;  %p1262_p13 = scmp.lt.s32.totalorder %s1253_s11, %s1253_s11 }
  0x3e   : > { %p1256_p7 = pnand %p1254_p5, %p1578_p12  ;;  %p1263_p1 = por %p1262_p13, %p1261_p11 }
  0x40   : > { %p1257_p9 = pneg %p1256_p7 }
  0x42   : > { %p1264_p2 = pnand %p1263_p1, %p1257_p9 }
  0x44   : > { %1267 = shalt.err (!%p1264_p2)
}
  0x45   : > { %1143 = dma.hbm_to_vmem [thread:$0]  (!%p1562_p10), %s2020_s3, 12800, %s1566_s14, [#allocation9], %s1465_s13, %s1465_s13, %s1466_s15  }
  0x46   : > { %s1268_s20 = scalar_lea.hbm %s2019_s2, 1280 }
  0x47   : > { %p1269_p6 = scmp.ne.s32.totalorder %s2019_s2, %s1268_s20  ;;  %p1275_p5 = scmp.lt.u32.totalorder %s1268_s20, %s2019_s2 }
  0x49   : > { %p1271_p0 = pnand %p1269_p6, %p1578_p12 }
  0x4b   : > { %p1272_p3 = pneg %p1271_p0 }
  0x4d   : > { %p1277_p7 = pnand %p1275_p5, %p1272_p3 }
  0x4f   : > { %1280 = shalt.err (!%p1277_p7)
}
  0x50   : > { %s1281_s11 = scalar_lea.vmem %s235_s16, 1280  ;;  %p1289_p1 = scmp.lt.s32.totalorder %s235_s16, %s235_s16 }
  0x51   : > { %p1282_p9 = scmp.ne.s32.totalorder %s235_s16, %s1281_s11  ;;  %p1290_p2 = scmp.lt.s32.totalorder %s1281_s11, %s1281_s11 }
  0x53   : > { %p1284_p11 = pnand %p1282_p9, %p1578_p12  ;;  %p1291_p4 = por %p1290_p2, %p1289_p1 }
  0x55   : > { %p1285_p13 = pneg %p1284_p11 }
  0x57   : > { %p1292_p8 = pnand %p1291_p4, %p1285_p13 }
  0x59   : > { %1295 = shalt.err (!%p1292_p8)
}
  0x5a   : > { %1140 = dma.hbm_to_vmem [thread:$0]  (!%p1562_p10), %s2019_s2, 1280, %s235_s16, [#allocation6], %s1465_s13, %s1465_s13, %s1466_s15  }
  0x5b   : > { %s1467_s17 = smov [#allocation10]   ;;  %s1468_s19 = smov [#allocation11]  }
  0x5c   : > { %s260_s18 = sshll.u32 %s1467_s17, 4  ;;  %s273_s20 = sshll.u32 %s1468_s19, 4  ;;  %s261_s18 = int_to_ptr.vmem [resolvable:$true] %s260_s18  ;;  %s274_s20 = int_to_ptr.vmem [resolvable:$true] %s273_s20 }
  0x5d   : > { %s1296_s29 = scalar_lea.hbm %s2021_s4, 1280 }
  0x5e   : > { %p1297_p4 = scmp.ne.s32.totalorder %s2021_s4, %s1296_s29  ;;  %p1303_p0 = scmp.lt.u32.totalorder %s1296_s29, %s2021_s4 }
  0x60   : > { %p1299_p8 = pnand %p1297_p4, %p1578_p12 }
  0x62   : > { %p1300_p6 = pneg %p1299_p8 }
  0x64   : > { %p1305_p3 = pnand %p1303_p0, %p1300_p6 }
  0x66   : > { %1308 = shalt.err (!%p1305_p3)
}
  0x67   : > { %s1309_s16 = scalar_lea.vmem %s261_s18, 1280  ;;  %p1317_p11 = scmp.lt.s32.totalorder %s261_s18, %s261_s18 }
  0x68   : > { %p1310_p5 = scmp.ne.s32.totalorder %s261_s18, %s1309_s16  ;;  %p1318_p13 = scmp.lt.s32.totalorder %s1309_s16, %s1309_s16 }
  0x6a   : > { %p1312_p7 = pnand %p1310_p5, %p1578_p12  ;;  %p1319_p1 = por %p1318_p13, %p1317_p11 }
  0x6c   : > { %p1313_p9 = pneg %p1312_p7 }
  0x6e   : > { %p1320_p2 = pnand %p1319_p1, %p1313_p9 }
  0x70   : > { %1323 = shalt.err (!%p1320_p2)
}
  0x71   : > { %1146 = dma.hbm_to_vmem [thread:$0]  (!%p1562_p10), %s2021_s4, 1280, %s261_s18, [#allocation9], %s1465_s13, %s1465_s13, %s1466_s15  }
  0x72   : > { %s1324_s21 = scalar_lea.hbm %s2022_s5, 1280 }
  0x73   : > { %p1325_p4 = scmp.ne.s32.totalorder %s2022_s5, %s1324_s21  ;;  %p1331_p0 = scmp.lt.u32.totalorder %s1324_s21, %s2022_s5 }
  0x75   : > { %p1327_p8 = pnand %p1325_p4, %p1578_p12 }
  0x77   : > { %p1328_p6 = pneg %p1327_p8 }
  0x79   : > { %p1333_p3 = pnand %p1331_p0, %p1328_p6 }
  0x7b   : > { %1336 = shalt.err (!%p1333_p3)
}
  0x7c   : > { %s1337_s14 = scalar_lea.vmem %s274_s20, 1280  ;;  %p1345_p11 = scmp.lt.s32.totalorder %s274_s20, %s274_s20 }
  0x7d   : > { %p1338_p5 = scmp.ne.s32.totalorder %s274_s20, %s1337_s14  ;;  %p1346_p13 = scmp.lt.s32.totalorder %s1337_s14, %s1337_s14 }
  0x7f   : > { %p1340_p7 = pnand %p1338_p5, %p1578_p12  ;;  %p1347_p1 = por %p1346_p13, %p1345_p11 }
  0x81   : > { %p1341_p9 = pneg %p1340_p7 }
  0x83   : > { %p1348_p2 = pnand %p1347_p1, %p1341_p9 }
  0x85   : > { %1351 = shalt.err (!%p1348_p2)
}
  0x86   : > { %1149 = dma.hbm_to_vmem [thread:$0]  (!%p1562_p10), %s2022_s5, 1280, %s274_s20, [#allocation12], %s1465_s13, %s1465_s13, %s1466_s15  }
  0x87   : > { %s1693_s22 = sadd.s32 1, %s1460_s27   ;;  %s33_s1 = sadd.s32 1, %s1456_s26 }
  0x88   : > { %s30_s12 = ssub.s32 %s1460_s27, %s1693_s22  ;;  %p40_p4 = scmp.ne.s32.totalorder %s1456_s26, %s1452_s25 }
  0x89   : > { %p31_p12 = scmp.eq.s32.totalorder %s30_s12, 0  ;;  %p41_p8 = scmp.eq.s32.totalorder %s1460_s27, 0 }
  0x8a   : > { %p1163_p6 = scmp.lt.s32.totalorder %s1460_s27, 3  ;;  %p2037_p3 = scmp.eq.s32.totalorder %s1533_s28, 2 }
  0x8b   : > { %s1703_s8 = scalar_select %p31_p12, %s1456_s26, %s33_s1  }
  0x8c   : > { %p42_p0 = por %p41_p8, %p40_p4  ;;  %p1707_p5 = por %p2037_p3, %p40_p4 }
  0x8d   : > { %s290_s19 = sand.u32 1, %s1456_s26   ;;  %s1096_s21 = sshll.u32 %s1460_s27, 7 }
  0x8e   : > { %s1095_s20 = sshll.u32 %s290_s19, 4  ;;  %s1716_s10 = scalar_lea.hbm %s2017_s0, %s1096_s21 }
  0x8f   : > { %s294_s11 = scalar_lea.vmem [#allocation2], %s1095_s20  ;;  %p1718_p10 = pnand %p1163_p6, %p42_p0 }
  0x90   : > { %s300_s14 = sshll.u32 %s294_s11, 4  ;;  %s1724_s16 = scalar_lea.sflag [#allocation3], %s290_s19  ;;  %s1722_s14 = int_to_ptr.vmem [resolvable:$true] %s300_s14 }
  0x91   : > { %s1352_s12 = scalar_lea.hbm %s1716_s10, 256  ;;  %p1354_p9 = pneg %p1718_p10 }
  0x92   : > { %p1353_p7 = scmp.ne.s32.totalorder %s1716_s10, %s1352_s12  ;;  %s1357_s20 = scalar_lea.hbm %s2017_s0, 768 }
  0x93   : > { %p1358_p1 = scmp.lt.u32.totalorder %s1716_s10, %s2017_s0  ;;  %p1359_p2 = scmp.lt.u32.totalorder %s1357_s20, %s1352_s12 }
  0x94   : > { %p1355_p11 = pnand %p1354_p9, %p1353_p7  ;;  %p1361_p4 = scmp.lt.u32.totalorder %s1352_s12, %s1716_s10 }
  0x95   : > { %p1360_p12 = por %p1359_p2, %p1358_p1 }
  0x96   : > { %p1356_p13 = pneg %p1355_p11 }
  0x97   : > { %p1362_p8 = por %p1361_p4, %p1360_p12 }
  0x99   : > { %p1363_p6 = pnand %p1362_p8, %p1356_p13 }
  0x9b   : > { %1366 = shalt.err (!%p1363_p6)
}
  0x9c   : > { %s1367_s19 = scalar_lea.vmem %s1722_s14, 256  ;;  %s1469_s11 = smov [#allocation2]  }
  0x9d   : > { %p1368_p0 = scmp.ne.s32.totalorder %s1722_s14, %s1367_s19  ;;  %s1372_s1 = sshll.u32 %s1469_s11, 4  ;;  %s1373_s1 = int_to_ptr.vmem [resolvable:$false] %s1372_s1 }
  0x9e   : > { %s1374_s21 = scalar_lea.vmem %s1373_s1, 512  ;;  %p1375_p11 = scmp.lt.s32.totalorder %s1722_s14, %s1373_s1 }
  0x9f   : > { %p1370_p3 = pnand %p1368_p0, %p1354_p9  ;;  %p1376_p1 = scmp.lt.s32.totalorder %s1374_s21, %s1367_s19 }
  0xa1   : > { %p1371_p7 = pneg %p1370_p3  ;;  %p1377_p2 = por %p1376_p1, %p1375_p11 }
  0xa3   : > { %p1378_p12 = pnand %p1377_p2, %p1371_p7 }
  0xa5   : > { %1381 = shalt.err (!%p1378_p12)
}
  0xa6   : > { %s1470_s12 = smov 384   ;;  %p2040_p9 = scmp.ne.s32.totalorder %s2033_s9, 0 }
  0xa7   : > { %1153 = dma.hbm_to_vmem [thread:$0]  (!%p1718_p10), %s1716_s10, 256, %s1722_s14, %s1724_s16, %s1470_s12, %s1465_s13, %s1466_s15  }
  0xa8   : > { %312 = sbr.rel (%p2040_p9) target bundleno = 301 (0x12d), region = 48  ;;  %s1757_s20 = sand.u32 (!%p2040_p9), 1, %s1452_s25  }
  0xa9   : > { %s1098_s23 = sshll.u32 (!%p2040_p9), %s1757_s20, 4  ;;  %s315_s29 = scalar_lea.sflag (!%p2040_p9), [#allocation3], %s1757_s20 }
  0xaa   : > { %s318_s19 = scalar_lea.vmem (!%p2040_p9), [#allocation2], %s1098_s23  ;;  %p2041_p13 = scmp.ne.s32.totalorder (!%p2040_p9), %s2030_s30, 0 }
  0xaf   : > { %1427 = dma.done.wait (%p2041_p13), %s315_s29, 256  }
  0xb0   : > { %1429 = vsyncadd (%p2041_p13), %s315_s29, 4294967040  ;;  %p2042_p4 = scmp.eq.s32.totalorder %s1533_s28, 0 }
  0xb2   : > { %1431 = dma.done.wait (%p2042_p4), [#allocation6], 3840   ;;  %p2043_p10 = pmov %p2042_p4 }
  0xb3   : > { %p2044_p8 = pmov %p2042_p4 }
  0xb4   : > { %1433 = vsyncadd (%p2043_p10), [#allocation6], 4294963456 }
  0xb5   : > { %1435 = dma.done.wait (%p2044_p8), [#allocation9], 14080   ;;  %p2045_p6 = pmov %p2042_p4 }
  0xb6   : > { %p2046_p0 = pmov %p2042_p4 }
  0xb7   : > { %1437 = vsyncadd (%p2045_p6), [#allocation9], 4294953216 }
  0xb8   : > { %1439 = dma.done.wait (%p2046_p0), [#allocation12], 1280   ;;  %p2047_p3 = pmov %p2046_p0 }
  0xb9   : > { %v1777_v0 = vld [vmem:[%s318_s19] sm:$0xff]  ;;  %v1779_v1 = vld [vmem:[%s318_s19 + $0x8] sm:$0xff]  ;;  %s1104_s13 = sshll.u32 %s1757_s20, 3  ;;  %s1107_s15 = sshll.u32 %s1533_s28, 7 }
  0xba   : > { %1441 = vsyncadd (%p2047_p3), [#allocation12], 4294966016  ;;  %v373_v2 = vld [vmem:[#allocation7] sm:$0xff]  ;;  %v378_v4 = vld [vmem:[#allocation5 + $0x8] sm:$0xff]  ;;  %s368_s10 = scalar_lea.vmem [#allocation13], %s1104_s13  ;;  %s1974_s11 = scalar_lea.hbm %s2024_s7, %s1107_s15 }
  0xbb   : > { %v374_v3 = vld [vmem:[#allocation5] sm:$0xff]  ;;  %v379_v6 = vmul.f32 %v1779_v1, %v378_v4  ;;  %v382_v7 = vld [vmem:[#allocation7 + $0x8] sm:$0xff]  ;;  %v384_v8 = vld [vmem:[#allocation5 + $0x10] sm:$0xff]  ;;  %s968_s14 = sshll.u32 %s368_s10, 4  ;;  %s955_s1 = scalar_lea.sflag [#allocation4], %s1757_s20  ;;  %s1976_s14 = int_to_ptr.vmem [resolvable:$true] %s968_s14 }
  0xbc   : > { %v375_v5 = vmul.f32 %v374_v3, %v1777_v0  ;;  %v388_v9 = vld [vmem:[#allocation5 + $0x18] sm:$0xff]  ;;  %v385_v10 = vmul.f32 %v384_v8, %v1777_v0  ;;  %v392_v12 = vld [vmem:[#allocation7 + $0x10] sm:$0xff]  ;;  %v394_v13 = vld [vmem:[#allocation5 + $0x20] sm:$0xff]  ;;  %s1382_s21 = scalar_lea.vmem %s1976_s14, 128  ;;  %s1471_s28 = smov [#allocation13]  }
  0xbd   : > { %v389_v11 = vmul.f32 %v1779_v1, %v388_v9  ;;  %v398_v14 = vld [vmem:[#allocation5 + $0x28] sm:$0xff]  ;;  %v395_v16 = vmul.f32 %v394_v13, %v1777_v0  ;;  %v402_v18 = vld [vmem:[#allocation7 + $0x18] sm:$0xff]  ;;  %v404_v19 = vld [vmem:[#allocation5 + $0x30] sm:$0xff]  ;;  %p1383_p7 = scmp.ne.s32.totalorder %s1976_s14, %s1382_s21  ;;  %s1386_s12 = sshll.u32 %s1471_s28, 4  ;;  %s1387_s12 = int_to_ptr.vmem [resolvable:$false] %s1386_s12 }
  0xbe   : > { %v376_v15 = vadd.f32 %v375_v5, %v373_v2  ;;  %v399_v17 = vmul.f32 %v1779_v1, %v398_v14  ;;  %v408_v20 = vld [vmem:[#allocation5 + $0x38] sm:$0xff]  ;;  %v386_v21 = vadd.f32 %v385_v10, %v382_v7  ;;  %v405_v22 = vmul.f32 %v404_v19, %v1777_v0  ;;  %v412_v24 = vld [vmem:[#allocation7 + $0x20] sm:$0xff]  ;;  %v418_v26 = vld [vmem:[#allocation5 + $0x48] sm:$0xff]  ;;  %s1388_s23 = scalar_lea.vmem %s1387_s12, 256  ;;  %p1389_p2 = scmp.lt.s32.totalorder %s1976_s14, %s1387_s12 }
  0xbf   : > { %v409_v23 = vmul.f32 %v1779_v1, %v408_v20  ;;  %v414_v25 = vld [vmem:[#allocation5 + $0x40] sm:$0xff]  ;;  %v396_v28 = vadd.f32 %v395_v16, %v392_v12  ;;  %v419_v30 = vmul.f32 %v1779_v1, %v418_v26  ;;  %v422_v31 = vld [vmem:[#allocation7 + $0x28] sm:$0xff]  ;;  %v424_v32 = vld [vmem:[#allocation5 + $0x50] sm:$0xff]  ;;  %p1384_p11 = pnand %p1383_p7, %p1707_p5  ;;  %p1390_p12 = scmp.lt.s32.totalorder %s1388_s23, %s1382_s21 }
  0xc0   : > { %v380_v27 = vadd.f32 %v379_v6, %v376_v15  ;;  %v415_v29 = vmul.f32 %v414_v25, %v1777_v0  ;;  %v428_v33 = vld [vmem:[#allocation5 + $0x58] sm:$0xff]  ;;  %v390_v34 = vadd.f32 %v389_v11, %v386_v21  ;;  %v406_v35 = vadd.f32 %v405_v22, %v402_v18  ;;  %v432_v38 = vld [vmem:[#allocation7 + $0x30] sm:$0xff]  ;;  %v434_v39 = vld [vmem:[#allocation5 + $0x60] sm:$0xff] }
  0xc1   : > { %v425_v36 = vmul.f32 %v424_v32, %v1777_v0  ;;  %v429_v37 = vmul.f32 %v1779_v1, %v428_v33  ;;  %v438_v40 = vld [vmem:[#allocation5 + $0x68] sm:$0xff]  ;;  %v400_v41 = vadd.f32 %v399_v17, %v396_v28  ;;  %v435_v43 = vmul.f32 %v434_v39, %v1777_v0  ;;  %v442_v45 = vld [vmem:[#allocation7 + $0x38] sm:$0xff]  ;;  %v444_v46 = vld [vmem:[#allocation5 + $0x70] sm:$0xff]  ;;  %p1385_p1 = pneg %p1384_p11  ;;  %p1391_p9 = por %p1390_p12, %p1389_p2 }
  0xc2   : > { %v416_v42 = vadd.f32 %v415_v29, %v412_v24  ;;  %v439_v44 = vmul.f32 %v1779_v1, %v438_v40  ;;  %v448_v47 = vld [vmem:[#allocation5 + $0x78] sm:$0xff]  ;;  %v410_v48 = vadd.f32 %v409_v23, %v406_v35  ;;  %v445_v50 = vmul.f32 %v444_v46, %v1777_v0  ;;  %v452_v52 = vld [vmem:[#allocation7 + $0x40] sm:$0xff]  ;;  %v458_v54 = vld [vmem:[#allocation5 + $0x88] sm:$0xff] }
  0xc3   : > { %v426_v49 = vadd.f32 %v425_v36, %v422_v31  ;;  %v449_v51 = vmul.f32 %v1779_v1, %v448_v47  ;;  %v454_v53 = vld [vmem:[#allocation5 + $0x80] sm:$0xff]  ;;  %v436_v56 = vadd.f32 %v435_v43, %v432_v38  ;;  %v459_v58 = vmul.f32 %v1779_v1, %v458_v54  ;;  %v462_v59 = vld [vmem:[#allocation7 + $0x48] sm:$0xff]  ;;  %v464_v60 = vld [vmem:[#allocation5 + $0x90] sm:$0xff]  ;;  %p1392_p13 = pnand %p1391_p9, %p1385_p1 }
  0xc4   : > { %v420_v55 = vadd.f32 %v419_v30, %v416_v42  ;;  %v455_v57 = vmul.f32 %v454_v53, %v1777_v0  ;;  %v468_v61 = vld [vmem:[#allocation5 + $0x98] sm:$0xff]  ;;  %v446_v63 = vadd.f32 %v445_v50, %v442_v45  ;;  %v465_v2 = vmul.f32 %v464_v60, %v1777_v0  ;;  %v482_v8 = vld [vmem:[#allocation8] sm:$0xff]  ;;  %v490_v15 = vld [vmem:[#allocation8 + $0x10] sm:$0xff] }
  0xc5   : > { %v430_v62 = vadd.f32 %v429_v37, %v426_v49  ;;  %v469_v3 = vmul.f32 %v1779_v1, %v468_v61  ;;  %v440_v4 = vadd.f32 %v439_v44, %v436_v56  ;;  %v1801_v6 = vmax.f32 %v380_v27, 0.0  ;;  %v486_v9 = vld [vmem:[#allocation8 + $0x8] sm:$0xff]  ;;  %v481_v14 = vld [vmem:[#allocation10] sm:$0xff]  ;;  %v524_v18 = vld [vmem:[#allocation8 + $0x50] sm:$0xff] }
  0xc6   : > { %v456_v5 = vadd.f32 %v455_v57, %v452_v52  ;;  %v1803_v7 = vmax.f32 %v390_v34, 0.0  ;;  %v450_v10 = vadd.f32 %v449_v51, %v446_v63  ;;  %v466_v11 = vadd.f32 %v465_v2, %v462_v59  ;;  %v528_v19 = vld [vmem:[#allocation8 + $0x58] sm:$0xff]  ;;  %v498_v24 = vld [vmem:[#allocation8 + $0x20] sm:$0xff]  ;;  %v502_v29 = vld [vmem:[#allocation8 + $0x28] sm:$0xff] }
  0xc7   : > { %v1805_v12 = vmax.f32 %v400_v41, 0.0  ;;  %v1807_v17 = vmax.f32 %v410_v48, 0.0  ;;  %v483_v0 = vmul.f32 %v482_v8, %v1801_v6  ;;  %v1811_v20 = vmax.f32 %v420_v55, 0.0  ;;  %v494_v23 = vld [vmem:[#allocation8 + $0x18] sm:$0xff]  ;;  %v522_v30 = vld [vmem:[#allocation10 + $0x8] sm:$0xff]  ;;  %v532_v31 = vld [vmem:[#allocation8 + $0x60] sm:$0xff] }
  0xc8   : > { %v460_v13 = vadd.f32 %v459_v58, %v456_v5  ;;  %v470_v16 = vadd.f32 %v469_v3, %v466_v11  ;;  %v487_v1 = vmul.f32 %v486_v9, %v1803_v7  ;;  %v1813_v21 = vmax.f32 %v430_v62, 0.0  ;;  %v506_v32 = vld [vmem:[#allocation8 + $0x30] sm:$0xff]  ;;  %v510_v33 = vld [vmem:[#allocation8 + $0x38] sm:$0xff]  ;;  %v514_v34 = vld [vmem:[#allocation8 + $0x40] sm:$0xff] }
  0xc9   : > { %v1815_v22 = vmax.f32 %v440_v4, 0.0  ;;  %v1817_v25 = vmax.f32 %v450_v10, 0.0  ;;  %v484_v27 = vadd.f32 %v483_v0, %v481_v14  ;;  %v491_v28 = vmul.f32 %v490_v15, %v1805_v12  ;;  %v536_v40 = vld [vmem:[#allocation8 + $0x68] sm:$0xff]  ;;  %v566_v41 = vld [vmem:[#allocation8 + $0xa0] sm:$0xff]  ;;  %v540_v48 = vld [vmem:[#allocation8 + $0x70] sm:$0xff] }
  0xca   : > { %v1819_v26 = vmax.f32 %v460_v13, 0.0  ;;  %v525_v35 = vmul.f32 %v524_v18, %v1801_v6  ;;  %v529_v36 = vmul.f32 %v528_v19, %v1803_v7  ;;  %v1824_v37 = vmax.f32 %v470_v16, 0.0  ;;  %v570_v42 = vld [vmem:[#allocation8 + $0xa8] sm:$0xff]  ;;  %v544_v49 = vld [vmem:[#allocation8 + $0x78] sm:$0xff]  ;;  %v548_v54 = vld [vmem:[#allocation8 + $0x80] sm:$0xff] }
  0xcb   : > { %v488_v38 = vadd.f32 %v487_v1, %v484_v27  ;;  %v495_v39 = vmul.f32 %v494_v23, %v1807_v17  ;;  %v499_v43 = vmul.f32 %v498_v24, %v1811_v20  ;;  %v503_v44 = vmul.f32 %v502_v29, %v1813_v21  ;;  %v518_v45 = vld [vmem:[#allocation8 + $0x48] sm:$0xff]  ;;  %v564_v55 = vld [vmem:[#allocation10 + $0x10] sm:$0xff]  ;;  %v578_v8 = vld [vmem:[#allocation8 + $0xb8] sm:$0xff] }
  0xcc   : > { %v526_v46 = vadd.f32 %v525_v35, %v522_v30  ;;  %v533_v47 = vmul.f32 %v532_v31, %v1805_v12  ;;  %v507_v51 = vmul.f32 %v506_v32, %v1815_v22  ;;  %v511_v52 = vmul.f32 %v510_v33, %v1817_v25  ;;  %v574_v56 = vld [vmem:[#allocation8 + $0xb0] sm:$0xff]  ;;  %v552_v59 = vld [vmem:[#allocation8 + $0x88] sm:$0xff]  ;;  %v612_v9 = vld [vmem:[#allocation8 + $0xf8] sm:$0xff] }
  0xcd   : > { %v492_v50 = vadd.f32 %v491_v28, %v488_v38  ;;  %v1833_v53 = vmul.f32 %v514_v34, %v1819_v26  ;;  %v537_v58 = vmul.f32 %v536_v40, %v1807_v17  ;;  %v556_v60 = vld [vmem:[#allocation8 + $0x90] sm:$0xff]  ;;  %v567_v61 = vmul.f32 %v566_v41, %v1801_v6  ;;  %v560_v13 = vld [vmem:[#allocation8 + $0x98] sm:$0xff]  ;;  %v616_v0 = vld [vmem:[#allocation8 + $0x100] sm:$0xff] }
  0xce   : > { %v530_v57 = vadd.f32 %v529_v36, %v526_v46  ;;  %v571_v62 = vmul.f32 %v570_v42, %v1803_v7  ;;  %v608_v63 = vld [vmem:[#allocation8 + $0xf0] sm:$0xff]  ;;  %v1839_v3 = vmul.f32 %v518_v45, %v1824_v37  ;;  %v541_v4 = vmul.f32 %v540_v48, %v1811_v20  ;;  %v606_v16 = vld [vmem:[#allocation10 + $0x18] sm:$0xff]  ;;  %v582_v23 = vld [vmem:[#allocation8 + $0xc0] sm:$0xff] }
  0xcf   : > { %v496_v2 = vadd.f32 %v495_v39, %v492_v50  ;;  %v545_v5 = vmul.f32 %v544_v49, %v1813_v21  ;;  %v549_v11 = vmul.f32 %v548_v54, %v1815_v22  ;;  %v568_v14 = vadd.f32 %v567_v61, %v564_v55  ;;  %v586_v24 = vld [vmem:[#allocation8 + $0xc8] sm:$0xff]  ;;  %v590_v31 = vld [vmem:[#allocation8 + $0xd0] sm:$0xff]  ;;  %v594_v36 = vld [vmem:[#allocation8 + $0xd8] sm:$0xff] }
  0xd0   : > { %v534_v10 = vadd.f32 %v533_v47, %v530_v57  ;;  %v575_v15 = vmul.f32 %v574_v56, %v1805_v12  ;;  %v553_v18 = vmul.f32 %v552_v59, %v1817_v25  ;;  %v1847_v19 = vmul.f32 %v556_v60, %v1819_v26  ;;  %v620_v33 = vld [vmem:[#allocation8 + $0x108] sm:$0xff]  ;;  %v650_v40 = vld [vmem:[#allocation8 + $0x140] sm:$0xff]  ;;  %v624_v46 = vld [vmem:[#allocation8 + $0x110] sm:$0xff] }
  0xd1   : > { %v500_v1 = vadd.f32 %v499_v43, %v496_v2  ;;  %v609_v27 = vmul.f32 %v608_v63, %v1801_v6  ;;  %v572_v29 = vadd.f32 %v571_v62, %v568_v14  ;;  %v579_v30 = vmul.f32 %v578_v8, %v1807_v17  ;;  %v654_v47 = vld [vmem:[#allocation8 + $0x148] sm:$0xff]  ;;  %v648_v54 = vld [vmem:[#allocation10 + $0x20] sm:$0xff]  ;;  %v658_v55 = vld [vmem:[#allocation8 + $0x150] sm:$0xff] }
  0xd2   : > { %v538_v28 = vadd.f32 %v537_v58, %v534_v10  ;;  %v613_v32 = vmul.f32 %v612_v9, %v1803_v7  ;;  %v1853_v35 = vmul.f32 %v560_v13, %v1824_v37  ;;  %v617_v39 = vmul.f32 %v616_v0, %v1805_v12  ;;  %v598_v59 = vld [vmem:[#allocation8 + $0xe0] sm:$0xff]  ;;  %v602_v60 = vld [vmem:[#allocation8 + $0xe8] sm:$0xff]  ;;  %v628_v61 = vld [vmem:[#allocation8 + $0x118] sm:$0xff] }
  0xd3   : > { %v504_v34 = vadd.f32 %v503_v44, %v500_v1  ;;  %v610_v38 = vadd.f32 %v609_v27, %v606_v16  ;;  %v576_v42 = vadd.f32 %v575_v15, %v572_v29  ;;  %v583_v43 = vmul.f32 %v582_v23, %v1811_v20  ;;  %v662_v8 = vld [vmem:[#allocation8 + $0x158] sm:$0xff]  ;;  %v632_v13 = vld [vmem:[#allocation8 + $0x120] sm:$0xff]  ;;  %v636_v14 = vld [vmem:[#allocation8 + $0x128] sm:$0xff] }
  0xd4   : > { %v542_v41 = vadd.f32 %v541_v4, %v538_v28  ;;  %v587_v45 = vmul.f32 %v586_v24, %v1813_v21  ;;  %v591_v49 = vmul.f32 %v590_v31, %v1815_v22  ;;  %v621_v50 = vmul.f32 %v620_v33, %v1807_v17  ;;  %v666_v24 = vld [vmem:[#allocation8 + $0x160] sm:$0xff]  ;;  %v644_v29 = vld [vmem:[#allocation8 + $0x138] sm:$0xff]  ;;  %v692_v31 = vld [vmem:[#allocation8 + $0x190] sm:$0xff] }
  0xd5   : > { %v508_v48 = vadd.f32 %v507_v51, %v504_v34  ;;  %v614_v44 = vadd.f32 %v613_v32, %v610_v38  ;;  %v580_v57 = vadd.f32 %v579_v30, %v576_v42  ;;  %v595_v58 = vmul.f32 %v594_v36, %v1817_v25  ;;  %v696_v32 = vld [vmem:[#allocation8 + $0x198] sm:$0xff] }
  0xd6   : > { %v546_v56 = vadd.f32 %v545_v5, %v542_v41  ;;  %v651_v62 = vmul.f32 %v650_v40, %v1801_v6  ;;  %v625_v51 = vmul.f32 %v624_v46, %v1811_v20  ;;  %v655_v4 = vmul.f32 %v654_v47, %v1803_v7  ;;  %v640_v5 = vld [vmem:[#allocation8 + $0x130] sm:$0xff]  ;;  %v700_v46 = vld [vmem:[#allocation8 + $0x1a0] sm:$0xff] }
  0xd7   : > { %v512_v63 = vadd.f32 %v511_v52, %v508_v48  ;;  %v618_v2 = vadd.f32 %v617_v39, %v614_v44  ;;  %v584_v10 = vadd.f32 %v583_v43, %v580_v57  ;;  %v659_v16 = vmul.f32 %v658_v55, %v1805_v12  ;;  %v670_v39 = vld [vmem:[#allocation8 + $0x168] sm:$0xff]  ;;  %v674_v40 = vld [vmem:[#allocation8 + $0x170] sm:$0xff]  ;;  %v678_v44 = vld [vmem:[#allocation8 + $0x178] sm:$0xff] }
  0xd8   : > { %v550_v9 = vadd.f32 %v549_v11, %v546_v56  ;;  %v652_v15 = vadd.f32 %v651_v62, %v648_v54  ;;  %v599_v0 = vmul.f32 %v598_v59, %v1819_v26  ;;  %v1867_v1 = vmul.f32 %v602_v60, %v1824_v37  ;;  %v686_v59 = vld [vmem:[#allocation8 + $0x188] sm:$0xff] }
  0xd9   : > { %v622_v52 = vadd.f32 %v621_v50, %v618_v2  ;;  %v629_v23 = vmul.f32 %v628_v61, %v1813_v21  ;;  %v588_v28 = vadd.f32 %v587_v45, %v584_v10  ;;  %v663_v30 = vmul.f32 %v662_v8, %v1807_v17  ;;  %v690_v45 = vld [vmem:[#allocation10 + $0x28] sm:$0xff]  ;;  %v682_v50 = vld [vmem:[#allocation8 + $0x180] sm:$0xff] }
  0xda   : > { %v554_v27 = vadd.f32 %v553_v18, %v550_v9  ;;  %v656_v11 = vadd.f32 %v655_v4, %v652_v15  ;;  %v633_v34 = vmul.f32 %v632_v13, %v1815_v22  ;;  %v637_v36 = vmul.f32 %v636_v14, %v1817_v25  ;;  %v704_v60 = vld [vmem:[#allocation8 + $0x1a8] sm:$0xff]  ;;  %v708_v13 = vld [vmem:[#allocation8 + $0x1b0] sm:$0xff]  ;;  %v712_v14 = vld [vmem:[#allocation8 + $0x1b8] sm:$0xff] }
  0xdb   : > { %v626_v33 = vadd.f32 %v625_v51, %v622_v52  ;;  %v641_v38 = vmul.f32 %v640_v5, %v1819_v26  ;;  %v516_v41 = vadd.f32 %v1833_v53, %v512_v63  ;;  %v592_v42 = vadd.f32 %v591_v49, %v588_v28  ;;  %v734_v51 = vld [vmem:[#allocation8 + $0x1e0] sm:$0xff]  ;;  %v738_v4 = vld [vmem:[#allocation8 + $0x1e8] sm:$0xff]  ;;  %v732_v52 = vld [vmem:[#allocation10 + $0x30] sm:$0xff] }
  0xdc   : > { %v660_v18 = vadd.f32 %v659_v16, %v656_v11  ;;  %v667_v43 = vmul.f32 %v666_v24, %v1811_v20  ;;  %v1877_v48 = vmul.f32 %v644_v29, %v1824_v37  ;;  %v693_v54 = vmul.f32 %v692_v31, %v1801_v6  ;;  %v720_v28 = vld [vmem:[#allocation8 + $0x1c8] sm:$0xff]  ;;  %v724_v29 = vld [vmem:[#allocation8 + $0x1d0] sm:$0xff] }
  0xdd   : > { %v630_v47 = vadd.f32 %v629_v23, %v626_v33  ;;  %v697_v55 = vmul.f32 %v696_v32, %v1803_v7  ;;  %v558_v56 = vadd.f32 %v1847_v19, %v554_v27  ;;  %v671_v53 = vmul.f32 %v670_v39, %v1813_v21  ;;  %v742_v23 = vld [vmem:[#allocation8 + $0x1f0] sm:$0xff]  ;;  %v716_v27 = vld [vmem:[#allocation8 + $0x1c0] sm:$0xff]  ;;  %v746_v39 = vld [vmem:[#allocation8 + $0x1f8] sm:$0xff] }
  0xde   : > { %v664_v57 = vadd.f32 %v663_v30, %v660_v18  ;;  %v675_v49 = vmul.f32 %v674_v40, %v1815_v22  ;;  %v596_v61 = vadd.f32 %v595_v58, %v592_v42  ;;  %v694_v63 = vadd.f32 %v693_v54, %v690_v45  ;;  %v776_v18 = vld [vmem:[#allocation8 + $0x230] sm:$0xff] }
  0xdf   : > { %v634_v62 = vadd.f32 %v633_v34, %v630_v47  ;;  %v701_v2 = vmul.f32 %v700_v46, %v1805_v12  ;;  %v1886_v8 = vadd.f32 %v1839_v3, %v516_v41  ;;  %v679_v19 = vmul.f32 %v678_v44, %v1817_v25  ;;  %v750_v44 = vld [vmem:[#allocation8 + $0x200] sm:$0xff] }
  0xe0   : > { %v668_v9 = vadd.f32 %v667_v43, %v664_v57  ;;  %v683_v10 = vmul.f32 %v682_v50, %v1819_v26  ;;  %v1891_v15 = vmul.f32 %v686_v59, %v1824_v37  ;;  %v698_v58 = vadd.f32 %v697_v55, %v694_v63  ;;  %v780_v43 = vld [vmem:[#allocation8 + $0x238] sm:$0xff]  ;;  %v754_v50 = vld [vmem:[#allocation8 + $0x208] sm:$0xff]  ;;  %v758_v57 = vld [vmem:[#allocation8 + $0x210] sm:$0xff] }
  0xe1   : > { %v638_v5 = vadd.f32 %v637_v36, %v634_v62  ;;  %v705_v16 = vmul.f32 %v704_v60, %v1807_v17  ;;  %v1895_v24 = vadd.f32 %v1853_v35, %v558_v56  ;;  %v735_v11 = vmul.f32 %v734_v51, %v1801_v6  ;;  %v728_v36 = vld [vmem:[#allocation8 + $0x1d8] sm:$0xff]  ;;  %v766_v62 = vld [vmem:[#allocation8 + $0x220] sm:$0xff] }
  0xe2   : > { %v672_v3 = vadd.f32 %v671_v53, %v668_v9  ;;  %v739_v30 = vmul.f32 %v738_v4, %v1803_v7  ;;  %v600_v31 = vadd.f32 %v599_v0, %v596_v61  ;;  %v702_v32 = vadd.f32 %v701_v2, %v698_v58  ;;  %v774_v53 = vld [vmem:[#allocation10 + $0x38] sm:$0xff]  ;;  %v770_v58 = vld [vmem:[#allocation8 + $0x228] sm:$0xff] }
  0xe3   : > { %v709_v33 = vmul.f32 %v708_v13, %v1811_v20  ;;  %v713_v34 = vmul.f32 %v712_v14, %v1813_v21  ;;  %v642_v40 = vadd.f32 %v641_v38, %v638_v5  ;;  %v736_v35 = vadd.f32 %v735_v11, %v732_v52  ;;  %v762_v61 = vld [vmem:[#allocation8 + $0x218] sm:$0xff]  ;;  %v788_v13 = vld [vmem:[#allocation8 + $0x248] sm:$0xff]  ;;  %v818_v14 = vld [vmem:[#allocation8 + $0x280] sm:$0xff] }
  0xe4   : > { %v676_v41 = vadd.f32 %v675_v49, %v672_v3  ;;  %v743_v42 = vmul.f32 %v742_v23, %v1805_v12  ;;  %v706_v45 = vadd.f32 %v705_v16, %v702_v32  ;;  %v717_v46 = vmul.f32 %v716_v27, %v1815_v22  ;;  %v784_v49 = vld [vmem:[#allocation8 + $0x240] sm:$0xff]  ;;  %v792_v23 = vld [vmem:[#allocation8 + $0x250] sm:$0xff]  ;;  %v822_v3 = vld [vmem:[#allocation8 + $0x288] sm:$0xff] }
  0xe5   : > { %v721_v47 = vmul.f32 %v720_v28, %v1817_v25  ;;  %v1905_v0 = vmul.f32 %v724_v29, %v1819_v26  ;;  %v1908_v55 = vmul.f32 %v728_v36, %v1824_v37  ;;  %v740_v38 = vadd.f32 %v739_v30, %v736_v35  ;;  %v796_v11 = vld [vmem:[#allocation8 + $0x258] sm:$0xff]  ;;  %v816_v30 = vld [vmem:[#allocation10 + $0x40] sm:$0xff] }
  0xe6   : > { %v680_v54 = vadd.f32 %v679_v19, %v676_v41  ;;  %v747_v56 = vmul.f32 %v746_v39, %v1807_v17  ;;  %v1912_v59 = vadd.f32 %v1867_v1, %v600_v31  ;;  %v710_v60 = vadd.f32 %v709_v33, %v706_v45  ;;  %v826_v31 = vld [vmem:[#allocation8 + $0x290] sm:$0xff]  ;;  %v800_v36 = vld [vmem:[#allocation8 + $0x260] sm:$0xff]  ;;  %v804_v39 = vld [vmem:[#allocation8 + $0x268] sm:$0xff] }
  0xe7   : > { %v777_v63 = vmul.f32 %v776_v18, %v1801_v6  ;;  %v781_v2 = vmul.f32 %v780_v43, %v1803_v7  ;;  %v1917_v51 = vadd.f32 %v1877_v48, %v642_v40  ;;  %v744_v4 = vadd.f32 %v743_v42, %v740_v38  ;;  %v830_v18 = vld [vmem:[#allocation8 + $0x298] sm:$0xff] }
  0xe8   : > { %v751_v9 = vmul.f32 %v750_v44, %v1811_v20  ;;  %v755_v19 = vmul.f32 %v754_v50, %v1813_v21  ;;  %v714_v5 = vadd.f32 %v713_v34, %v710_v60  ;;  %v759_v1 = vmul.f32 %v758_v57, %v1815_v22  ;;  %v864_v38 = vld [vmem:[#allocation8 + $0x2d8] sm:$0xff] }
  0xe9   : > { %v778_v16 = vadd.f32 %v777_v63, %v774_v53  ;;  %v785_v52 = vmul.f32 %v784_v49, %v1805_v12  ;;  %v684_v27 = vadd.f32 %v683_v10, %v680_v54  ;;  %v748_v28 = vadd.f32 %v747_v56, %v744_v4  ;;  %v860_v54 = vld [vmem:[#allocation8 + $0x2d0] sm:$0xff]  ;;  %v812_v60 = vld [vmem:[#allocation8 + $0x278] sm:$0xff] }
  0xea   : > { %v763_v48 = vmul.f32 %v762_v61, %v1817_v25  ;;  %v767_v29 = vmul.f32 %v766_v62, %v1819_v26  ;;  %v718_v32 = vadd.f32 %v717_v46, %v714_v5  ;;  %v789_v34 = vmul.f32 %v788_v13, %v1807_v17  ;;  %v808_v46 = vld [vmem:[#allocation8 + $0x270] sm:$0xff]  ;;  %v834_v61 = vld [vmem:[#allocation8 + $0x2a0] sm:$0xff]  ;;  %v858_v13 = vld [vmem:[#allocation10 + $0x48] sm:$0xff] }
  0xeb   : > { %v782_v33 = vadd.f32 %v781_v2, %v778_v16  ;;  %v819_v40 = vmul.f32 %v818_v14, %v1801_v6  ;;  %v752_v41 = vadd.f32 %v751_v9, %v748_v28  ;;  %v1928_v35 = vmul.f32 %v770_v58, %v1824_v37  ;;  %v838_v9 = vld [vmem:[#allocation8 + $0x2a8] sm:$0xff]  ;;  %v868_v14 = vld [vmem:[#allocation8 + $0x2e0] sm:$0xff] }
  0xec   : > { %v793_v10 = vmul.f32 %v792_v23, %v1811_v20  ;;  %v823_v42 = vmul.f32 %v822_v3, %v1803_v7  ;;  %v797_v45 = vmul.f32 %v796_v11, %v1813_v21  ;;  %v827_v50 = vmul.f32 %v826_v31, %v1805_v12  ;;  %v850_v28 = vld [vmem:[#allocation8 + $0x2c0] sm:$0xff]  ;;  %v872_v11 = vld [vmem:[#allocation8 + $0x2e8] sm:$0xff] }
  0xed   : > { %v786_v43 = vadd.f32 %v785_v52, %v782_v33  ;;  %v820_v44 = vadd.f32 %v819_v40, %v816_v30  ;;  %v1935_v56 = vadd.f32 %v1891_v15, %v684_v27  ;;  %v756_v57 = vadd.f32 %v755_v19, %v752_v41  ;;  %v842_v15 = vld [vmem:[#allocation8 + $0x2b0] sm:$0xff]  ;;  %v846_v27 = vld [vmem:[#allocation8 + $0x2b8] sm:$0xff] }
  0xee   : > { %v801_v53 = vmul.f32 %v800_v36, %v1815_v22  ;;  %v805_v49 = vmul.f32 %v804_v39, %v1817_v25  ;;  %v722_v62 = vadd.f32 %v721_v47, %v718_v32  ;;  %v831_v4 = vmul.f32 %v830_v18, %v1807_v17  ;;  %v876_v36 = vld [vmem:[#allocation8 + $0x2f0] sm:$0xff] }
  0xef   : > { %v790_v63 = vadd.f32 %v789_v34, %v786_v43  ;;  %v824_v2 = vadd.f32 %v823_v42, %v820_v44  ;;  %v760_v5 = vadd.f32 %v759_v1, %v756_v57  ;;  %v809_v58 = vmul.f32 %v808_v46, %v1819_v26  ;;  %v884_v46 = vld [vmem:[#allocation8 + $0x300] sm:$0xff] }
  0xf0   : > { %v861_v19 = vmul.f32 %v860_v54, %v1801_v6  ;;  %v865_v16 = vmul.f32 %v864_v38, %v1803_v7  ;;  %v813_v23 = vmul.f32 %v812_v60, %v1824_v37  ;;  %v835_v47 = vmul.f32 %v834_v61, %v1811_v20  ;;  %v914_v38 = vld [vmem:[#allocation11 + $0x8] sm:$0xff]  ;;  %v854_v61 = vld [vmem:[#allocation8 + $0x2c8] sm:$0xff] }
  0xf1   : > { %v794_v52 = vadd.f32 %v793_v10, %v790_v63  ;;  %v828_v3 = vadd.f32 %v827_v50, %v824_v2  ;;  %v764_v30 = vadd.f32 %v763_v48, %v760_v5  ;;  %v839_v31 = vmul.f32 %v838_v9, %v1813_v21  ;;  %v880_v48 = vld [vmem:[#allocation8 + $0x2f8] sm:$0xff]  ;;  %v888_v63 = vld [vmem:[#allocation8 + $0x308] sm:$0xff] }
  0xf2   : > { %v862_v1 = vadd.f32 %v861_v19, %v858_v13  ;;  %v869_v32 = vmul.f32 %v868_v14, %v1805_v12  ;;  %v726_v33 = vadd.f32 %v1905_v0, %v722_v62  ;;  %v843_v7 = vmul.f32 %v842_v15, %v1815_v22  ;;  %v910_v0 = vld [vmem:[#allocation11] sm:$0xff]  ;;  %v922_v9 = vld [vmem:[#allocation11 + $0x18] sm:$0xff] }
  0xf3   : > { %v798_v6 = vadd.f32 %v797_v45, %v794_v52  ;;  %v832_v34 = vadd.f32 %v831_v4, %v828_v3  ;;  %v847_v39 = vmul.f32 %v846_v27, %v1817_v25  ;;  %v851_v40 = vmul.f32 %v850_v28, %v1819_v26  ;;  %v892_v13 = vld [vmem:[#allocation8 + $0x310] sm:$0xff] }
  0xf4   : > { %v866_v41 = vadd.f32 %v865_v16, %v862_v1  ;;  %v873_v10 = vmul.f32 %v872_v11, %v1807_v17  ;;  %v768_v42 = vadd.f32 %v767_v29, %v764_v30  ;;  %v899_v12 = vmax.f32 %v1886_v8, 0.0  ;;  %v918_v8 = vld [vmem:[#allocation11 + $0x10] sm:$0xff]  ;;  %v930_v30 = vld [vmem:[#allocation11 + $0x28] sm:$0xff] }
  0xf5   : > { %v802_v18 = vadd.f32 %v801_v53, %v798_v6  ;;  %v836_v43 = vadd.f32 %v835_v47, %v832_v34  ;;  %v877_v44 = vmul.f32 %v876_v36, %v1811_v20  ;;  %v900_v50 = vmax.f32 %v1895_v24, 0.0  ;;  %v909_v53 = vld [vmem:[%s2023_s6] sm:$0xff]  ;;  %v934_v34 = vld [vmem:[#allocation11 + $0x30] sm:$0xff] }
  0xf6   : > { %v870_v45 = vadd.f32 %v869_v32, %v866_v41  ;;  %v901_v54 = vmax.f32 %v1912_v59, 0.0  ;;  %v730_v57 = vadd.f32 %v1908_v55, %v726_v33  ;;  %v881_v29 = vmul.f32 %v880_v48, %v1813_v21 }
  0xf7   : > { %v806_v60 = vadd.f32 %v805_v49, %v802_v18  ;;  %v840_v17 = vadd.f32 %v839_v31, %v836_v43  ;;  %v885_v20 = vmul.f32 %v884_v46, %v1815_v22  ;;  %v902_v24 = vmax.f32 %v1917_v51, 0.0  ;;  %v926_v51 = vld [vmem:[#allocation11 + $0x20] sm:$0xff]  ;;  %v946_v46 = vld [vmem:[#allocation11 + $0x48] sm:$0xff] }
  0xf8   : > { %v874_v62 = vadd.f32 %v873_v10, %v870_v45  ;;  %v911_v59 = vmul.f32 %v910_v0, %v899_v12  ;;  %v772_v2 = vadd.f32 %v1928_v35, %v768_v42  ;;  %v915_v4 = vmul.f32 %v914_v38, %v900_v50  ;;  %v896_v35 = vld [vmem:[#allocation8 + $0x318] sm:$0xff] }
  0xf9   : > { %v810_v55 = vadd.f32 %v809_v58, %v806_v60  ;;  %v844_v49 = vadd.f32 %v843_v7, %v840_v17  ;;  %v903_v14 = vmax.f32 %v1935_v56, 0.0  ;;  %v919_v15 = vmul.f32 %v918_v8, %v901_v54 }
  0xfa   : > { %v878_v21 = vadd.f32 %v877_v44, %v874_v62  ;;  %v912_v5 = vadd.f32 %v911_v59, %v909_v53  ;;  %v855_v16 = vmul.f32 %v854_v61, %v1824_v37  ;;  %v889_v22 = vmul.f32 %v888_v63, %v1817_v25 }
  0xfb   : > { %v848_v19 = vadd.f32 %v847_v39, %v844_v49  ;;  %v904_v52 = vmax.f32 %v730_v57, 0.0  ;;  %v814_v3 = vadd.f32 %v813_v23, %v810_v55  ;;  %v923_v27 = vmul.f32 %v922_v9, %v902_v24  ;;  %v938_v39 = vld [vmem:[#allocation11 + $0x38] sm:$0xff] }
  0xfc   : > { %v882_v47 = vadd.f32 %v881_v29, %v878_v21  ;;  %v916_v58 = vadd.f32 %v915_v4, %v912_v5  ;;  %v893_v11 = vmul.f32 %v892_v13, %v1819_v26  ;;  %v905_v56 = vmax.f32 %v772_v2, 0.0  ;;  %v942_v26 = vld [vmem:[#allocation11 + $0x40] sm:$0xff] }
  0xfd   : > { %v852_v28 = vadd.f32 %v851_v40, %v848_v19  ;;  %v927_v32 = vmul.f32 %v926_v51, %v903_v14  ;;  %v897_v6 = vmul.f32 %v896_v35, %v1824_v37  ;;  %v906_v7 = vmax.f32 %v814_v3, 0.0 }
  0xfe   : > { %v886_v31 = vadd.f32 %v885_v20, %v882_v47  ;;  %v920_v1 = vadd.f32 %v919_v15, %v916_v58  ;;  %v931_v23 = vmul.f32 %v930_v30, %v904_v52  ;;  %v935_v40 = vmul.f32 %v934_v34, %v905_v56 }
  0xff   : > { %v856_v33 = vadd.f32 %v855_v16, %v852_v28  ;;  %v939_v43 = vmul.f32 %v938_v39, %v906_v7 }
 0x100   : > { %v890_v25 = vadd.f32 %v889_v22, %v886_v31  ;;  %v924_v36 = vadd.f32 %v923_v27, %v920_v1 }
 0x101   : > { %v907_v10 = vmax.f32 %v856_v33, 0.0 }
 0x102   : > { %v894_v41 = vadd.f32 %v893_v11, %v890_v25  ;;  %v928_v48 = vadd.f32 %v927_v32, %v924_v36 }
 0x103   : > { %v943_v37 = vmul.f32 %v942_v26, %v907_v10 }
 0x104   : > { %v898_v42 = vadd.f32 %v897_v6, %v894_v41  ;;  %v932_v18 = vadd.f32 %v931_v23, %v928_v48 }
 0x106   : > { %v908_v12 = vmax.f32 %v898_v42, 0.0  ;;  %v936_v0 = vadd.f32 %v935_v40, %v932_v18 }
 0x108   : > { %v940_v45 = vadd.f32 %v939_v43, %v936_v0  ;;  %v947_v44 = vmul.f32 %v946_v46, %v908_v12 }
 0x10a   : > { %v944_v50 = vadd.f32 %v943_v37, %v940_v45 }
 0x10c   : > { %v948_v54 = vadd.f32 %v947_v44, %v944_v50 }
 0x10e   : > { %v949_v38 = vmul.f32 0.5, %v948_v54 }
 0x110   : > { %1210 = vtanh.f32 %v949_v38 }
 0x11a   : > { %v1211_v57 = vpop.eup %1210 }
 0x11b   : > { %v951_v60 = vadd.f32 1.0, %v1211_v57 }
 0x11d   : > { %v952_v17 = vmul.f32 0.5, %v951_v60 }
 0x11f   : > { %953 = vst [vmem:[%s368_s10] sm:$0xff] %v952_v17 }
 0x120   : > { %1395 = shalt.err (!%p1392_p13)
}
 0x121   : > { %s1396_s20 = scalar_lea.hbm %s1974_s11, 128  ;;  %s1400_s30 = scalar_lea.hbm %s2024_s7, 384 }
 0x122   : > { %p1397_p4 = scmp.ne.s32.totalorder %s1974_s11, %s1396_s20  ;;  %p1401_p6 = scmp.lt.u32.totalorder %s1974_s11, %s2024_s7 }
 0x123   : > { %p1402_p0 = scmp.lt.u32.totalorder %s1400_s30, %s1396_s20  ;;  %p1404_p7 = scmp.lt.u32.totalorder %s1396_s20, %s1974_s11 }
 0x124   : > { %p1398_p10 = pnand %p1397_p4, %p1707_p5 }
 0x125   : > { %p1403_p3 = por %p1402_p0, %p1401_p6 }
 0x126   : > { %p1399_p8 = pneg %p1398_p10 }
 0x127   : > { %p1405_p11 = por %p1404_p7, %p1403_p3 }
 0x129   : > { %p1406_p1 = pnand %p1405_p11, %p1399_p8 }
 0x12b   : > { %1409 = shalt.err (!%p1406_p1)
}
 0x12c   : > { %1132 = dma.vmem_to_hbm [thread:$0]  (%p1707_p5), %s1976_s14, 128, %s1974_s11, %s955_s1  }
 0x12d PF: > { %s2048_s15 = sld [smem:[#allocation19_spill]]  ;;  %p1169_p2 = scmp.ge.s32.totalorder %s1460_s27, 2 }
 0x12e   : > { %s980_s10 = sand.u32 1, %s1448_s24  }
 0x12f   : > { %s981_s18 = scalar_lea.sflag [#allocation4], %s980_s10 }
 0x133   : > { %p2049_p12 = scmp.ne.s32.totalorder %s2048_s15, 0 }
 0x135   : > { %p1155_p9 = pnand %p1169_p2, %p2049_p12 }
 0x137   : > { %1443 = dma.done.wait (!%p1155_p9), %s981_s18, 128  }
 0x138   : > { %1445 = vsyncadd (!%p1155_p9), %s981_s18, 4294967168  ;;  %p23_p13 = scmp.ge.s32.totalorder %s1693_s22, 5   ;;  %s2050_s24 = smov %s1452_s25 }
 0x139   : > { %s2051_s25 = smov %s1456_s26  ;;  %s2052_s26 = smov %s1703_s8 }
 0x13a   : > { %s2053_s27 = smov %s1693_s22  ;;  %25 = sbr.rel (!%p23_p13) target bundleno = 10 (0xa), region = 259 }
 0x141   :  { %986 = vsyncpa [#allocation3], 1 }
 0x142   :  { %988 = vsyncpa [#allocation3 + $0x1], 1 }
 0x143   :  { %989 = vsyncpa [#allocation6], 1 }
 0x144   :  { %990 = vsyncpa [#allocation9], 1 }
 0x145   :  { %991 = vsyncpa [#allocation12], 1 }
 0x146   :  { %992 = vsyncpa [#allocation4], 1 }
 0x147   :  { %994 = vsyncpa [#allocation4 + $0x1], 1 }

</bundles_post_ra>
